<compile_context>
chip_gen: v5e
topology: v5e:2x2
jax: 0.10.0
libtpu: 0.0.40
codegen_flags: <defaults>
</compile_context>

<pallas_src>
import math

import jax
import jax.numpy as jnp
from jax.experimental import pallas as pl
from jax.experimental.pallas import tpu as pltpu

# ---- constants matching the PyTorch module --------------------------------
C = 3.0                  # Poincare ball curvature (hardcoded c = 3 in __init__)
TEMP = 0.1               # temperature
MIN_NORM = 1e-15         # geoopt MIN_NORM
BALL_EPS_F32 = 4e-3      # geoopt BALL_EPS for float32 (used by project())
SQRT_C = math.sqrt(C)
MAXNORM = (1.0 - BALL_EPS_F32) / SQRT_C
INV_SQRT2 = 1.0 / math.sqrt(2.0)
OUT_SCALE = -2.0 / (SQRT_C * TEMP)      # fold -(2/sqrt(c))/temp into one constant


def _gelu_exact(x):
    # nn.GELU() default = exact (erf-based) GELU; kept for semantic fidelity.
    return 0.5 * x * (1.0 + jax.lax.erf(x * jnp.float32(INV_SQRT2)))


def hyperbolic_uniform_kernel(x_ref, w1_ref, b1_ref, w2_ref, b2_ref,
                              w3_ref, b3_ref, pt_ref, p2_ref, beta_ref, out_ref):
    bf16 = jnp.bfloat16
    f32 = jnp.float32

    # ---- Mlp: fc1 -> GELU -> fc2 -> GELU -> fc3 (bf16 MXU inputs, f32 acc) ----
    x = x_ref[...].astype(bf16)                                              # (TB, K)
    h = jnp.dot(x, w1_ref[...], preferred_element_type=f32) + b1_ref[...]
    h = _gelu_exact(h)
    h = jnp.dot(h.astype(bf16), w2_ref[...], preferred_element_type=f32) + b2_ref[...]
    h = _gelu_exact(h)
    e = jnp.dot(h.astype(bf16), w3_ref[...], preferred_element_type=f32) + b3_ref[...]  # (TB, D) f32

    sqrt_c = jnp.float32(SQRT_C)

    # ---- ball.expmap0(e): tanh(sqrt(c)*||u||) * u / (sqrt(c)*||u||) ----------
    u_norm = jnp.maximum(jnp.sqrt(jnp.sum(e * e, axis=-1, keepdims=True)),
                         jnp.float32(MIN_NORM))                              # (TB, 1)
    su = sqrt_c * u_norm
    t = jnp.tanh(su)
    y = (t * pl.reciprocal(su, approx=True)) * e                             # (TB, D)

    # ---- geoopt project(): ||y|| = tanh(su)/sqrt(c) analytically, rescale ----
    y_norm = jnp.maximum(t * jnp.float32(1.0 / SQRT_C), jnp.float32(MIN_NORM))
    scale = jnp.minimum(jnp.float32(1.0),
                        jnp.float32(MAXNORM) * pl.reciprocal(y_norm, approx=True))
    y = y * scale
    y_norm_post = jnp.minimum(y_norm, jnp.float32(MAXNORM))
    y2 = y_norm_post * y_norm_post                                           # (TB, 1)

    # ---- dist(prototypes, y) via ||mobius_add(-p, y)|| -----------------------
    p2 = p2_ref[...]                                                         # (1, P_pad)  ||p||^2
    beta = beta_ref[...]                                                     # (1, P_pad)  1 - c*||p||^2
    xy = jnp.dot(y.astype(bf16), pt_ref[...], preferred_element_type=f32)    # (TB, P_pad)  y . p

    c = jnp.float32(C)
    alpha = 1.0 - 2.0 * c * xy + c * y2                                      # (TB, P_pad)
    num2 = alpha * alpha * p2 - 2.0 * alpha * beta * xy + beta * beta * y2
    num2 = jnp.maximum(num2, 0.0)
    denom = jnp.maximum(1.0 - 2.0 * c * xy + (c * c) * p2 * y2, jnp.float32(MIN_NORM))
    m_norm = jnp.sqrt(num2) * pl.reciprocal(denom, approx=True)

    # dist = 2/sqrt(c) * artanh(sqrt(c) * ||mobius_add(-p, y)||), clamped like geoopt
    arg = jnp.clip(sqrt_c * m_norm, 0.0, jnp.float32(1.0 - 1e-7))
    atanh = 0.5 * (jnp.log1p(arg) - jnp.log1p(-arg))

    out_ref[...] = jnp.float32(OUT_SCALE) * atanh                            # = -dist / temp


def _round_up(n, m):
    return ((n + m - 1) // m) * m


def prepare_hyperbolic_uniform(params, prototypes):
    """One-time (init-time) preprocessing, hoisted out of the per-call path:
    bf16 weights, prototype scaling/padding/transpose, ||p||^2 and beta."""
    w1, b1, w2, b2, w3, b3 = params
    f32, bf16 = jnp.float32, jnp.bfloat16
    P, D = prototypes.shape
    P_pad = _round_up(P, 128)                            # lane-dense logits
    proto_scaled = prototypes.astype(f32) * jnp.float32(0.95 / C)   # module: prototypes * 0.95 / c
    proto_p = jnp.zeros((P_pad, D), f32).at[:P, :].set(proto_scaled)
    p2 = jnp.sum(proto_p * proto_p, axis=1).reshape(1, P_pad)
    beta = 1.0 - jnp.float32(C) * p2
    return dict(
        w1=w1.astype(bf16), b1=b1.reshape(1, -1).astype(f32),
        w2=w2.astype(bf16), b2=b2.reshape(1, -1).astype(f32),
        w3=w3.astype(bf16), b3=b3.reshape(1, -1).astype(f32),
        proto_t=proto_p.T.astype(bf16),                  # (D, P_pad): natural MXU RHS
        p2=p2, beta=beta, num_prototypes=P)


def _choose_tiling(batch, max_tile=512):
    if batch < 16:
        return batch, 1                                  # single full-extent tile, no padding
    n_tiles = max(2, -(-batch // max_tile))              # >= 2 grid steps (v7x: 2 TensorCores)
    n_tiles += n_tiles % 2                               # even step count for 2-way sharding
    tile_b = _round_up(-(-batch // n_tiles), 8)
    return tile_b, n_tiles


def hyperbolic_uniform_forward(x, prepared, *, max_tile_b=512):
    """x: (B, in_features); prepared: output of prepare_hyperbolic_uniform."""
    f32 = jnp.float32
    B, K = x.shape
    H = prepared["w1"].shape[1]
    D = prepared["w3"].shape[1]
    P_pad = prepared["p2"].shape[1]
    P = prepared["num_prototypes"]

    tile_b, n_tiles = _choose_tiling(B, max_tile_b)
    B_pad = tile_b * n_tiles

    x_p = x.astype(f32)
    if B_pad != B:
        x_p = jnp.pad(x_p, ((0, B_pad - B), (0, 0)))     # at most tile_b-1 dead rows

    def full2d(shape):
        return pl.BlockSpec(shape, lambda i: (0, 0))     # grid-invariant -> VMEM resident

    out = pl.pallas_call(
        hyperbolic_uniform_kernel,
        out_shape=jax.ShapeDtypeStruct((B_pad, P_pad), f32),
        grid=(n_tiles,),
        in_specs=[
            pl.BlockSpec((tile_b, K), lambda i: (i, 0)),  # x: batch-tiled, unpadded K
            full2d((K, H)), full2d((1, H)),               # fc1 (bf16 W, f32 b)
            full2d((H, H)), full2d((1, H)),               # fc2
            full2d((H, D)), full2d((1, D)),               # fc3
            full2d((D, P_pad)),                           # prototypes^T (bf16)
            full2d((1, P_pad)), full2d((1, P_pad)),       # ||p||^2, beta (f32)
        ],
        out_specs=pl.BlockSpec((tile_b, P_pad), lambda i: (i, 0)),
        compiler_params=pltpu.CompilerParams(
            dimension_semantics=("parallel",)),
    )(x_p, prepared["w1"], prepared["b1"], prepared["w2"], prepared["b2"],
      prepared["w3"], prepared["b3"], prepared["proto_t"], prepared["p2"],
      prepared["beta"])

    # TODO(synk): if the consumer can take the padded (B_pad, P_pad) buffer, skip this slice.
    return out[:B, :P]


if __name__ == "__main__":
    # Small shapes consistent with the module (backbone=None branch => hidden=256).
    B, IN_FEATURES, HIDDEN, D, P = 32, 16, 256, 64, 10

    key = jax.random.PRNGKey(0)
    k = jax.random.split(key, 8)

    # Deterministic synthetic parameters (Linear weights stored as (in, out)).
    w1 = jax.random.normal(k[0], (IN_FEATURES, HIDDEN), jnp.float32) / math.sqrt(IN_FEATURES)
    b1 = jax.random.normal(k[1], (HIDDEN,), jnp.float32) * 0.01
    w2 = jax.random.normal(k[2], (HIDDEN, HIDDEN), jnp.float32) / math.sqrt(HIDDEN)
    b2 = jax.random.normal(k[3], (HIDDEN,), jnp.float32) * 0.01
    w3 = jax.random.normal(k[4], (HIDDEN, D), jnp.float32) / math.sqrt(HIDDEN)
    b3 = jax.random.normal(k[5], (D,), jnp.float32) * 0.01
    params = (w1, b1, w2, b2, w3, b3)

    # Unit-norm prototypes (the 0.95/c scaling from __init__ happens in prepare()).
    proto = jax.random.normal(k[6], (P, D), jnp.float32)
    proto = proto / jnp.linalg.norm(proto, axis=-1, keepdims=True)

    x = jax.random.normal(k[7], (B, IN_FEATURES), jnp.float32)

    prepared = prepare_hyperbolic_uniform(params, proto)
    logits = hyperbolic_uniform_forward(x, prepared)
    jax.block_until_ready(logits)

    assert logits.shape == (B, P) and logits.dtype == jnp.float32
    assert bool(jnp.all(jnp.isfinite(logits)))
    print("KERNEL_OK")
</pallas_src>

<mosaic_0001>
module attributes {stable_mosaic.version = 11 : i64} {
  func.func @hyperbolic_uniform_kernel(%arg0: i32, %arg1: memref<16x16xf32, #tpu.memory_space<vmem>>, %arg2: memref<16x256xbf16, #tpu.memory_space<vmem>>, %arg3: memref<1x256xf32, #tpu.memory_space<vmem>>, %arg4: memref<256x256xbf16, #tpu.memory_space<vmem>>, %arg5: memref<1x256xf32, #tpu.memory_space<vmem>>, %arg6: memref<256x64xbf16, #tpu.memory_space<vmem>>, %arg7: memref<1x64xf32, #tpu.memory_space<vmem>>, %arg8: memref<64x128xbf16, #tpu.memory_space<vmem>>, %arg9: memref<1x128xf32, #tpu.memory_space<vmem>>, %arg10: memref<1x128xf32, #tpu.memory_space<vmem>>, %arg11: memref<16x128xf32, #tpu.memory_space<vmem>>) attributes {dimension_semantics = [#tpu.dimension_semantics<parallel>], iteration_bounds = array<i64: 2>, scalar_prefetch = 0 : i64, scratch_operands = 0 : i64, tpu.core_type = #tpu.core_type<tc>, window_params = [{transform_indices = @transform_0, window_bounds = array<i64: 16, 16>}, {pipeline_mode = #tpu.pipeline_mode<synchronous>, transform_indices = @transform_1, window_bounds = array<i64: 16, 256>}, {pipeline_mode = #tpu.pipeline_mode<synchronous>, transform_indices = @transform_2, window_bounds = array<i64: 1, 256>}, {pipeline_mode = #tpu.pipeline_mode<synchronous>, transform_indices = @transform_3, window_bounds = array<i64: 256, 256>}, {pipeline_mode = #tpu.pipeline_mode<synchronous>, transform_indices = @transform_4, window_bounds = array<i64: 1, 256>}, {pipeline_mode = #tpu.pipeline_mode<synchronous>, transform_indices = @transform_5, window_bounds = array<i64: 256, 64>}, {pipeline_mode = #tpu.pipeline_mode<synchronous>, transform_indices = @transform_6, window_bounds = array<i64: 1, 64>}, {pipeline_mode = #tpu.pipeline_mode<synchronous>, transform_indices = @transform_7, window_bounds = array<i64: 64, 128>}, {pipeline_mode = #tpu.pipeline_mode<synchronous>, transform_indices = @transform_8, window_bounds = array<i64: 1, 128>}, {pipeline_mode = #tpu.pipeline_mode<synchronous>, transform_indices = @transform_9, window_bounds = array<i64: 1, 128>}, {transform_indices = @transform_10, window_bounds = array<i64: 16, 128>}]} {
    %c0 = arith.constant 0 : index
    %c0_0 = arith.constant 0 : index
    %0 = vector.load %arg1[%c0, %c0_0] : memref<16x16xf32, #tpu.memory_space<vmem>>, vector<16x16xf32>
    %1 = arith.truncf %0 : vector<16x16xf32> to vector<16x16xbf16>
    %c0_1 = arith.constant 0 : index
    %c0_2 = arith.constant 0 : index
    %2 = vector.load %arg2[%c0_1, %c0_2] : memref<16x256xbf16, #tpu.memory_space<vmem>>, vector<16x256xbf16>
    %cst = arith.constant dense<0.000000e+00> : vector<16x256xf32>
    %3 = tpu.matmul %1, %2, %cst {dimension_numbers = #tpu.dot_dimension_numbers<[1], [0], [0], [1], [0, 0, 1, 1], [], []>} : vector<16x16xbf16>, vector<16x256xbf16>, vector<16x256xf32> -> vector<16x256xf32>
    %c0_3 = arith.constant 0 : index
    %c0_4 = arith.constant 0 : index
    %4 = vector.load %arg3[%c0_3, %c0_4] : memref<1x256xf32, #tpu.memory_space<vmem>>, vector<1x256xf32>
    %5 = vector.broadcast %4 : vector<1x256xf32> to vector<16x256xf32>
    %6 = arith.addf %3, %5 : vector<16x256xf32>
    %cst_5 = arith.constant 5.000000e-01 : f32
    %7 = vector.broadcast %cst_5 : f32 to vector<16x256xf32>
    %8 = arith.mulf %7, %6 : vector<16x256xf32>
    %cst_6 = arith.constant 0.707106769 : f32
    %9 = vector.broadcast %cst_6 : f32 to vector<16x256xf32>
    %10 = arith.mulf %6, %9 : vector<16x256xf32>
    %11 = math.erf %10 : vector<16x256xf32>
    %cst_7 = arith.constant 1.000000e+00 : f32
    %12 = vector.broadcast %cst_7 : f32 to vector<16x256xf32>
    %13 = arith.addf %12, %11 : vector<16x256xf32>
    %14 = arith.mulf %8, %13 : vector<16x256xf32>
    %15 = arith.truncf %14 : vector<16x256xf32> to vector<16x256xbf16>
    %c0_8 = arith.constant 0 : index
    %c0_9 = arith.constant 0 : index
    %16 = vector.load %arg4[%c0_8, %c0_9] : memref<256x256xbf16, #tpu.memory_space<vmem>>, vector<256x256xbf16>
    %cst_10 = arith.constant dense<0.000000e+00> : vector<16x256xf32>
    %17 = tpu.matmul %15, %16, %cst_10 {dimension_numbers = #tpu.dot_dimension_numbers<[1], [0], [0], [1], [0, 0, 1, 1], [], []>} : vector<16x256xbf16>, vector<256x256xbf16>, vector<16x256xf32> -> vector<16x256xf32>
    %c0_11 = arith.constant 0 : index
    %c0_12 = arith.constant 0 : index
    %18 = vector.load %arg5[%c0_11, %c0_12] : memref<1x256xf32, #tpu.memory_space<vmem>>, vector<1x256xf32>
    %19 = vector.broadcast %18 : vector<1x256xf32> to vector<16x256xf32>
    %20 = arith.addf %17, %19 : vector<16x256xf32>
    %cst_13 = arith.constant 5.000000e-01 : f32
    %21 = vector.broadcast %cst_13 : f32 to vector<16x256xf32>
    %22 = arith.mulf %21, %20 : vector<16x256xf32>
    %cst_14 = arith.constant 0.707106769 : f32
    %23 = vector.broadcast %cst_14 : f32 to vector<16x256xf32>
    %24 = arith.mulf %20, %23 : vector<16x256xf32>
    %25 = math.erf %24 : vector<16x256xf32>
    %cst_15 = arith.constant 1.000000e+00 : f32
    %26 = vector.broadcast %cst_15 : f32 to vector<16x256xf32>
    %27 = arith.addf %26, %25 : vector<16x256xf32>
    %28 = arith.mulf %22, %27 : vector<16x256xf32>
    %29 = arith.truncf %28 : vector<16x256xf32> to vector<16x256xbf16>
    %c0_16 = arith.constant 0 : index
    %c0_17 = arith.constant 0 : index
    %30 = vector.load %arg6[%c0_16, %c0_17] : memref<256x64xbf16, #tpu.memory_space<vmem>>, vector<256x64xbf16>
    %cst_18 = arith.constant dense<0.000000e+00> : vector<16x64xf32>
    %31 = tpu.matmul %29, %30, %cst_18 {dimension_numbers = #tpu.dot_dimension_numbers<[1], [0], [0], [1], [0, 0, 1, 1], [], []>} : vector<16x256xbf16>, vector<256x64xbf16>, vector<16x64xf32> -> vector<16x64xf32>
    %c0_19 = arith.constant 0 : index
    %c0_20 = arith.constant 0 : index
    %32 = vector.load %arg7[%c0_19, %c0_20] : memref<1x64xf32, #tpu.memory_space<vmem>>, vector<1x64xf32>
    %33 = vector.broadcast %32 : vector<1x64xf32> to vector<16x64xf32>
    %34 = arith.addf %31, %33 : vector<16x64xf32>
    %35 = arith.mulf %34, %34 : vector<16x64xf32>
    %cst_21 = arith.constant dense<0.000000e+00> : vector<16xf32>
    %36 = vector.multi_reduction <add>, %35, %cst_21 [1] : vector<16x64xf32> to vector<16xf32>
    %37 = vector.shape_cast %36 : vector<16xf32> to vector<16x1xf32>
    %38 = math.sqrt %37 : vector<16x1xf32>
    %cst_22 = arith.constant 1.000000e-15 : f32
    %39 = vector.broadcast %cst_22 : f32 to vector<16x1xf32>
    %40 = arith.maximumf %38, %39 : vector<16x1xf32>
    %cst_23 = arith.constant 1.73205078 : f32
    %41 = vector.broadcast %cst_23 : f32 to vector<16x1xf32>
    %42 = arith.mulf %41, %40 : vector<16x1xf32>
    %43 = math.tanh %42 : vector<16x1xf32>
    %44 = tpu.reciprocal %42 {approx = true} : vector<16x1xf32> -> vector<16x1xf32>
    %45 = arith.mulf %43, %44 : vector<16x1xf32>
    %46 = vector.broadcast %45 : vector<16x1xf32> to vector<16x64xf32>
    %47 = arith.mulf %46, %34 : vector<16x64xf32>
    %cst_24 = arith.constant 0.577350259 : f32
    %48 = vector.broadcast %cst_24 : f32 to vector<16x1xf32>
    %49 = arith.mulf %43, %48 : vector<16x1xf32>
    %cst_25 = arith.constant 1.000000e-15 : f32
    %50 = vector.broadcast %cst_25 : f32 to vector<16x1xf32>
    %51 = arith.maximumf %49, %50 : vector<16x1xf32>
    %52 = tpu.reciprocal %51 {approx = true} : vector<16x1xf32> -> vector<16x1xf32>
    %cst_26 = arith.constant 0.575040877 : f32
    %53 = vector.broadcast %cst_26 : f32 to vector<16x1xf32>
    %54 = arith.mulf %53, %52 : vector<16x1xf32>
    %cst_27 = arith.constant 1.000000e+00 : f32
    %55 = vector.broadcast %cst_27 : f32 to vector<16x1xf32>
    %56 = arith.minimumf %55, %54 : vector<16x1xf32>
    %57 = vector.broadcast %56 : vector<16x1xf32> to vector<16x64xf32>
    %58 = arith.mulf %47, %57 : vector<16x64xf32>
    %cst_28 = arith.constant 0.575040877 : f32
    %59 = vector.broadcast %cst_28 : f32 to vector<16x1xf32>
    %60 = arith.minimumf %51, %59 : vector<16x1xf32>
    %61 = arith.mulf %60, %60 : vector<16x1xf32>
    %c0_29 = arith.constant 0 : index
    %c0_30 = arith.constant 0 : index
    %62 = vector.load %arg9[%c0_29, %c0_30] : memref<1x128xf32, #tpu.memory_space<vmem>>, vector<1x128xf32>
    %c0_31 = arith.constant 0 : index
    %c0_32 = arith.constant 0 : index
    %63 = vector.load %arg10[%c0_31, %c0_32] : memref<1x128xf32, #tpu.memory_space<vmem>>, vector<1x128xf32>
    %64 = arith.truncf %58 : vector<16x64xf32> to vector<16x64xbf16>
    %c0_33 = arith.constant 0 : index
    %c0_34 = arith.constant 0 : index
    %65 = vector.load %arg8[%c0_33, %c0_34] : memref<64x128xbf16, #tpu.memory_space<vmem>>, vector<64x128xbf16>
    %cst_35 = arith.constant dense<0.000000e+00> : vector<16x128xf32>
    %66 = tpu.matmul %64, %65, %cst_35 {dimension_numbers = #tpu.dot_dimension_numbers<[1], [0], [0], [1], [0, 0, 1, 1], [], []>} : vector<16x64xbf16>, vector<64x128xbf16>, vector<16x128xf32> -> vector<16x128xf32>
    %cst_36 = arith.constant 2.000000e+00 : f32
    %cst_37 = arith.constant 3.000000e+00 : f32
    %67 = arith.mulf %cst_36, %cst_37 : f32
    %68 = vector.broadcast %67 : f32 to vector<16x128xf32>
    %69 = arith.mulf %68, %66 : vector<16x128xf32>
    %cst_38 = arith.constant 1.000000e+00 : f32
    %70 = vector.broadcast %cst_38 : f32 to vector<16x128xf32>
    %71 = arith.subf %70, %69 : vector<16x128xf32>
    %cst_39 = arith.constant 3.000000e+00 : f32
    %72 = vector.broadcast %cst_39 : f32 to vector<16x1xf32>
    %73 = arith.mulf %72, %61 : vector<16x1xf32>
    %74 = vector.broadcast %73 : vector<16x1xf32> to vector<16x128xf32>
    %75 = arith.addf %71, %74 : vector<16x128xf32>
    %76 = arith.mulf %75, %75 : vector<16x128xf32>
    %77 = vector.broadcast %62 : vector<1x128xf32> to vector<16x128xf32>
    %78 = arith.mulf %76, %77 : vector<16x128xf32>
    %cst_40 = arith.constant 2.000000e+00 : f32
    %79 = vector.broadcast %cst_40 : f32 to vector<16x128xf32>
    %80 = arith.mulf %79, %75 : vector<16x128xf32>
    %81 = vector.broadcast %63 : vector<1x128xf32> to vector<16x128xf32>
    %82 = arith.mulf %80, %81 : vector<16x128xf32>
    %83 = arith.mulf %82, %66 : vector<16x128xf32>
    %84 = arith.subf %78, %83 : vector<16x128xf32>
    %85 = arith.mulf %63, %63 : vector<1x128xf32>
    %86 = vector.broadcast %85 : vector<1x128xf32> to vector<16x128xf32>
    %87 = vector.broadcast %61 : vector<16x1xf32> to vector<16x128xf32>
    %88 = arith.mulf %86, %87 : vector<16x128xf32>
    %89 = arith.addf %84, %88 : vector<16x128xf32>
    %cst_41 = arith.constant 0.000000e+00 : f32
    %90 = vector.broadcast %cst_41 : f32 to vector<16x128xf32>
    %91 = arith.maximumf %89, %90 : vector<16x128xf32>
    %cst_42 = arith.constant 2.000000e+00 : f32
    %cst_43 = arith.constant 3.000000e+00 : f32
    %92 = arith.mulf %cst_42, %cst_43 : f32
    %93 = vector.broadcast %92 : f32 to vector<16x128xf32>
    %94 = arith.mulf %93, %66 : vector<16x128xf32>
    %cst_44 = arith.constant 1.000000e+00 : f32
    %95 = vector.broadcast %cst_44 : f32 to vector<16x128xf32>
    %96 = arith.subf %95, %94 : vector<16x128xf32>
    %cst_45 = arith.constant 3.000000e+00 : f32
    %cst_46 = arith.constant 3.000000e+00 : f32
    %97 = arith.mulf %cst_45, %cst_46 : f32
    %98 = vector.broadcast %97 : f32 to vector<1x128xf32>
    %99 = arith.mulf %98, %62 : vector<1x128xf32>
    %100 = vector.broadcast %99 : vector<1x128xf32> to vector<16x128xf32>
    %101 = vector.broadcast %61 : vector<16x1xf32> to vector<16x128xf32>
    %102 = arith.mulf %100, %101 : vector<16x128xf32>
    %103 = arith.addf %96, %102 : vector<16x128xf32>
    %cst_47 = arith.constant 1.000000e-15 : f32
    %104 = vector.broadcast %cst_47 : f32 to vector<16x128xf32>
    %105 = arith.maximumf %103, %104 : vector<16x128xf32>
    %106 = math.sqrt %91 : vector<16x128xf32>
    %107 = tpu.reciprocal %105 {approx = true} : vector<16x128xf32> -> vector<16x128xf32>
    %108 = arith.mulf %106, %107 : vector<16x128xf32>
    %cst_48 = arith.constant 1.73205078 : f32
    %109 = vector.broadcast %cst_48 : f32 to vector<16x128xf32>
    %110 = arith.mulf %109, %108 : vector<16x128xf32>
    %cst_49 = arith.constant 0.000000e+00 : f32
    %cst_50 = arith.constant 0.99999988 : f32
    %111 = vector.broadcast %cst_49 : f32 to vector<16x128xf32>
    %112 = arith.maximumf %111, %110 : vector<16x128xf32>
    %113 = vector.broadcast %cst_50 : f32 to vector<16x128xf32>
    %114 = arith.minimumf %113, %112 : vector<16x128xf32>
    %115 = math.log1p %114 : vector<16x128xf32>
    %cst_51 = arith.constant 0.000000e+00 : f32
    %116 = vector.broadcast %cst_51 : f32 to vector<16x128xf32>
    %117 = arith.subf %116, %114 : vector<16x128xf32>
    %118 = math.log1p %117 : vector<16x128xf32>
    %119 = arith.subf %115, %118 : vector<16x128xf32>
    %cst_52 = arith.constant 5.000000e-01 : f32
    %120 = vector.broadcast %cst_52 : f32 to vector<16x128xf32>
    %121 = arith.mulf %120, %119 : vector<16x128xf32>
    %cst_53 = arith.constant -11.5470057 : f32
    %122 = vector.broadcast %cst_53 : f32 to vector<16x128xf32>
    %123 = arith.mulf %122, %121 : vector<16x128xf32>
    %c0_54 = arith.constant 0 : index
    %c0_55 = arith.constant 0 : index
    %124 = vector.load %arg11[%c0_54, %c0_55] : memref<16x128xf32, #tpu.memory_space<vmem>>, vector<16x128xf32>
    tpu.vector_store %arg11[%c0_54, %c0_55], %123 {strides = array<i32>} : memref<16x128xf32, #tpu.memory_space<vmem>>, vector<16x128xf32>,
    return
  }
  func.func @transform_0(%arg0: i32) -> (i32, i32) {
    %c0_i32 = arith.constant 0 : i32
    %c0_i32_0 = arith.constant 0 : i32
    return %arg0, %c0_i32 : i32, i32
  }
  func.func @transform_1(%arg0: i32) -> (i32, i32) {
    %c0_i32 = arith.constant 0 : i32
    %c0_i32_0 = arith.constant 0 : i32
    %c0_i32_1 = arith.constant 0 : i32
    return %c0_i32, %c0_i32_0 : i32, i32
  }
  func.func @transform_2(%arg0: i32) -> (i32, i32) {
    %c0_i32 = arith.constant 0 : i32
    %c0_i32_0 = arith.constant 0 : i32
    %c0_i32_1 = arith.constant 0 : i32
    return %c0_i32, %c0_i32_0 : i32, i32
  }
  func.func @transform_3(%arg0: i32) -> (i32, i32) {
    %c0_i32 = arith.constant 0 : i32
    %c0_i32_0 = arith.constant 0 : i32
    %c0_i32_1 = arith.constant 0 : i32
    return %c0_i32, %c0_i32_0 : i32, i32
  }
  func.func @transform_4(%arg0: i32) -> (i32, i32) {
    %c0_i32 = arith.constant 0 : i32
    %c0_i32_0 = arith.constant 0 : i32
    %c0_i32_1 = arith.constant 0 : i32
    return %c0_i32, %c0_i32_0 : i32, i32
  }
  func.func @transform_5(%arg0: i32) -> (i32, i32) {
    %c0_i32 = arith.constant 0 : i32
    %c0_i32_0 = arith.constant 0 : i32
    %c0_i32_1 = arith.constant 0 : i32
    return %c0_i32, %c0_i32_0 : i32, i32
  }
  func.func @transform_6(%arg0: i32) -> (i32, i32) {
    %c0_i32 = arith.constant 0 : i32
    %c0_i32_0 = arith.constant 0 : i32
    %c0_i32_1 = arith.constant 0 : i32
    return %c0_i32, %c0_i32_0 : i32, i32
  }
  func.func @transform_7(%arg0: i32) -> (i32, i32) {
    %c0_i32 = arith.constant 0 : i32
    %c0_i32_0 = arith.constant 0 : i32
    %c0_i32_1 = arith.constant 0 : i32
    return %c0_i32, %c0_i32_0 : i32, i32
  }
  func.func @transform_8(%arg0: i32) -> (i32, i32) {
    %c0_i32 = arith.constant 0 : i32
    %c0_i32_0 = arith.constant 0 : i32
    %c0_i32_1 = arith.constant 0 : i32
    return %c0_i32, %c0_i32_0 : i32, i32
  }
  func.func @transform_9(%arg0: i32) -> (i32, i32) {
    %c0_i32 = arith.constant 0 : i32
    %c0_i32_0 = arith.constant 0 : i32
    %c0_i32_1 = arith.constant 0 : i32
    return %c0_i32, %c0_i32_0 : i32, i32
  }
  func.func @transform_10(%arg0: i32) -> (i32, i32) {
    %c0_i32 = arith.constant 0 : i32
    %c0_i32_0 = arith.constant 0 : i32
    return %arg0, %c0_i32 : i32, i32
  }
}

</mosaic_0001>

<bundles_post_ra>
// kernel: tpu_custom_call.1
= control target key start
LH: loop header
LB: loop body
LE: loop exit
PB: predicated region body
PF: predicated region fallthrough
CT: control target
= control target key end

     0   :  { %s2522_s0 = inlined_call_operand.vmem [shape: f32[32,16], index: 0, kind: input, shape index: {}]   ;;  %s2523_s1 = inlined_call_operand.vmem [shape: bf16[16,256], index: 1, kind: input, shape index: {}]   ;;  %s2524_s2 = inlined_call_operand.vmem [shape: f32[1,256], index: 2, kind: input, shape index: {}]   ;;  %s2525_s3 = inlined_call_operand.hbm [shape: bf16[256,256], index: 3, kind: input, shape index: {}]   ;;  %s2526_s4 = inlined_call_operand.vmem [shape: f32[1,256], index: 4, kind: input, shape index: {}]   ;;  %s2527_s5 = inlined_call_operand.vmem [shape: bf16[256,64], index: 5, kind: input, shape index: {}]   ;;  %s2528_s6 = inlined_call_operand.vmem [shape: f32[1,64], index: 6, kind: input, shape index: {}]   ;;  %s2529_s7 = inlined_call_operand.vmem [shape: bf16[64,128], index: 7, kind: input, shape index: {}]   ;;  %s2530_s8 = inlined_call_operand.vmem [shape: f32[1,128], index: 8, kind: input, shape index: {}]   ;;  %s2531_s9 = inlined_call_operand.vmem [shape: f32[1,128], index: 9, kind: input, shape index: {}]   ;;  %s2532_s10 = inlined_call_operand.hbm [shape: f32[32,128], index: 10, kind: output, shape index: {}]  }
   0x1   :  { %2533 = sst [smem:[#allocation9_spill]] %s2525_s3 }
   0x2   :  { %15 = vsyncpa [#allocation3], 0 }
   0x3   :  { %16 = vsyncpa [#allocation4], 0 }
   0x4   :  { %18 = vsyncpa [#allocation4 + $0x1], 0  ;;  %s2090_s13 = smov 0   ;;  %s2092_s14 = smov 0  }
   0x5   :  { %s2094_s15 = smov 0   ;;  %s2096_s16 = smov 0  }
   0x6 LB: > { %s2111_s17 = sadd.s32 4294967295, %s2028_s16   ;;  %s1531_s18 = sadd.s32 4294967294, %s2028_s16   ;;  %s2028_s16 = sphi %s2096_s16, %s2548_s16   ;;  %s2024_s15 = sphi %s2094_s15, %s2547_s15   ;;  %s2020_s14 = sphi %s2092_s14, %s2546_s14   ;;  %s2016_s13 = sphi %s2090_s13, %s2545_s13  }
   0x7   : > { %s2115_s19 = sadd.s32 1, %s2028_s16   ;;  %s246_s20 = sadd.s32 1, %s2024_s15 }
   0x8   : > { %s243_s21 = ssub.s32 %s2028_s16, %s2115_s19  ;;  %p256_p0 = scmp.ne.s32.totalorder %s2024_s15, %s2020_s14 }
   0x9   : > { %p244_p1 = scmp.eq.s32.totalorder %s243_s21, 0  ;;  %p257_p2 = scmp.eq.s32.totalorder %s2111_s17, 1 }
   0xa   : > { %p262_p3 = scmp.ne.s32.totalorder %s2020_s14, %s2016_s13  ;;  %p263_p4 = scmp.eq.s32.totalorder %s1531_s18, 1 }
   0xb   : > { %s2126_s22 = scalar_select %p244_p1, %s2024_s15, %s246_s20  }
   0xc   : > { %p2128_p5 = por %p257_p2, %p256_p0  ;;  %p2132_p6 = por %p263_p4, %p262_p3 }
   0xd   : > { %2534 = sst [smem:[#allocation8_spill]] %s2126_s22  ;;  %p1532_p7 = scmp.ge.s32.totalorder %s2028_s16, 1 }
   0xe   : > { %p270_p8 = scmp.lt.s32.totalorder %s2028_s16, 3  ;;  %p1841_p9 = scmp.eq.s32.totalorder %s2111_s17, 0 }
   0xf   : > { %s2537_s3 = sld [smem:[#allocation9_spill]]  ;;  %s2030_s28 = smov [#allocation2]  }
  0x10   : > { %p271_p10 = pnand %p1532_p7, %p270_p8  ;;  %s289_s29 = sshll.u32 %s2030_s28, 4  ;;  %s290_s29 = int_to_ptr.vmem [resolvable:$true] %s289_s29 }
  0x11   : > { %s2031_s30 = smov 128   ;;  %s2032_s11 = smov 8  }
  0x12   : > { %p1833_p11 = pneg %p271_p10  ;;  %332 = sbr.rel (%p271_p10) target bundleno = 938 (0x3aa), region = 60 }
  0x14   : > { %p1834_p12 = pnand %p1841_p9, %p1833_p11 }
  0x15   : > { %s287_s27 = sshll.u32 %s2537_s3, 4  ;;  %s288_s27 = int_to_ptr.hbm [resolvable:$true] %s287_s27 }
  0x16   : > { %1836 = dma.hbm_to_vmem [thread:$0]  (!%p1834_p12), %s288_s27, 4096, %s290_s29, [#allocation3], %s2031_s30, %s2031_s30, %s2032_s11  }
  0x17   : > { %2007 = dma.done.wait (%p1841_p9), [#allocation3], 4096  }
  0x18   : > { %2009 = vsyncadd (%p1841_p9), [#allocation3], 4294963200  ;;  %s1538_s12 = sshll.u32 %s2111_s17, 1  ;;  %v1542_v0 = vld [vmem:[%s2523_s1] sm:$0xf]  ;;  %vm400_vm0 = vcmask 130048  }
  0x19   : > { %p372_p13 = scmp.lt.s32.totalorder %s1538_s12, 3  ;;  %v1773_v1 = vld [vmem:[%s2523_s1 + $0x4] sm:$0xf0]  ;;  %v1772_v2 = vld [vmem:[%s2523_s1 + $0x4] sm:$0xf]  ;;  %s368_s3 = sand.u32 1, %s2020_s14  }
  0x1a   : > { %v1543_v3 = vor.u32 %v1773_v1, %v1542_v0  ;;  %v1544_v4 = vld [vmem:[%s2523_s1 + $0x8] sm:$0xf0]  ;;  %v384_v9 = vld [vmem:[%s2524_s2] sm:$0x3]  ;;  %v1612_v12 = vld [vmem:[#allocation2 + $0x70] sm:$0xf] }
  0x1b   : > { %s2550_s12 = smov (!%p372_p13, %s1538_s12), 3  ;;  %v1547_v7 = vor.u32 %v1772_v2, %v1544_v4  ;;  %v386_v10 = vperm.slane %v384_v9, 0  ;;  %v387_v11 = vperm.slane %v384_v9, 1  ;;  %v1789_v13 = vld [vmem:[#allocation2 + $0x74] sm:$0xf0]  ;;  %s1537_s22 = sshll.u32 %s368_s3, 4 }
  0x1c   : > { %s1539_s18 = sshll.u32 %s2550_s12, 3  ;;  %411 = vmatpush.bf16.msra.mxu0 %v1543_v3  ;;  %v1676_v14 = vld [vmem:[#allocation2 + $0xf0] sm:$0xf]  ;;  %v1613_v16 = vor.u32 %v1789_v13, %v1612_v12  ;;  %v1805_v17 = vld [vmem:[#allocation2 + $0xf4] sm:$0xf0]  ;;  %s1826_s20 = sshll.u32 %s2111_s17, 4 }
  0x1d   : > { %s375_s25 = scalar_lea.vmem %s2522_s0, %s1539_s18  ;;  %425 = vmatpush.bf16.msra.mxu1 %v1547_v7  ;;  %v1788_v18 = vld [vmem:[#allocation2 + $0x74] sm:$0xf]  ;;  %v1614_v19 = vld [vmem:[#allocation2 + $0x78] sm:$0xf0]  ;;  %v1677_v22 = vor.u32 %v1805_v17, %v1676_v14  ;;  %v1604_v28 = vld [vmem:[#allocation2 + $0x60] sm:$0xf]  ;;  %s1453_s28 = scalar_lea.hbm %s2532_s10, %s1826_s20 }
  0x1e   : > { %v379_v5 = vld [vmem:[%s375_s25] sm:$0xff]  ;;  %v380_v6 = vld [vmem:[%s375_s25 + $0x8] sm:$0xff]  ;;  %v1617_v23 = vor.u32 %v1788_v18, %v1614_v19  ;;  %v1804_v24 = vld [vmem:[#allocation2 + $0xf4] sm:$0xf]  ;;  %808 = vmatpush.bf16.msra.mxu2 %v1613_v16  ;;  %s370_s21 = scalar_lea.vmem [#allocation5], %s1537_s22  ;;  %s1456_s27 = sshll.u32 %s1453_s28, 4  ;;  %s1457_s27 = int_to_ptr.hbm [resolvable:$true] %s1456_s27 }
  0x1f   : > { %v381_v8 = vpack.c.bf16 %v380_v6, %v379_v5  ;;  %v1678_v25 = vld [vmem:[#allocation2 + $0xf8] sm:$0xf0]  ;;  %822 = vmatpush.bf16.msra.mxu3 %v1677_v22  ;;  %v1787_v30 = vld [vmem:[#allocation2 + $0x64] sm:$0xf0]  ;;  %v1668_v32 = vld [vmem:[#allocation2 + $0xe0] sm:$0xf] }
  0x20   : > { %v1681_v26 = vor.u32 %v1804_v24, %v1678_v25  ;;  %836 = vmatpush.bf16.msrb.mxu0 %v1617_v23  ;;  %v1605_v31 = vor.u32 %v1787_v30, %v1604_v28  ;;  %v1803_v33 = vld [vmem:[#allocation2 + $0xe4] sm:$0xf0]  ;;  %v1786_v34 = vld [vmem:[#allocation2 + $0x64] sm:$0xf]  ;;  %v1606_v36 = vld [vmem:[#allocation2 + $0x68] sm:$0xf0] }
  0x21   : > { %1548 = vmatmul.msk.bf16.vlgmr.msra.gmra.mxu0 %vm400_vm0, %v381_v8  ;;  %1549 = vmatmul.msk.bf16.vlgmr.msra.gmra.mxu1 %vm400_vm0, %v381_v8  ;;  %v1669_v35 = vor.u32 %v1803_v33, %v1668_v32  ;;  %v1802_v37 = vld [vmem:[#allocation2 + $0xe4] sm:$0xf]  ;;  %v1670_v38 = vld [vmem:[#allocation2 + $0xe8] sm:$0xf0]  ;;  %v1609_v40 = vor.u32 %v1786_v34, %v1606_v36  ;;  %v1596_v42 = vld [vmem:[#allocation2 + $0x50] sm:$0xf] }
  0x22   : > { %850 = vmatpush.bf16.msrb.mxu1 %v1681_v26  ;;  %809 = vmatpush.bf16.msra.mxu2 %v1605_v31  ;;  %v1673_v41 = vor.u32 %v1802_v37, %v1670_v38  ;;  %v1785_v43 = vld [vmem:[#allocation2 + $0x54] sm:$0xf0]  ;;  %v1660_v46 = vld [vmem:[#allocation2 + $0xd0] sm:$0xf]  ;;  %v1784_v51 = vld [vmem:[#allocation2 + $0x54] sm:$0xf] }
  0x23   : > { %823 = vmatpush.bf16.msra.mxu3 %v1669_v35  ;;  %v1597_v45 = vor.u32 %v1785_v43, %v1596_v42  ;;  %v1801_v47 = vld [vmem:[#allocation2 + $0xd4] sm:$0xf0]  ;;  %v1598_v52 = vld [vmem:[#allocation2 + $0x58] sm:$0xf0]  ;;  %v1800_v55 = vld [vmem:[#allocation2 + $0xd4] sm:$0xf] }
  0x24   : > { %837 = vmatpush.bf16.msrb.mxu0 %v1609_v40  ;;  %v1661_v50 = vor.u32 %v1801_v47, %v1660_v46  ;;  %v1601_v54 = vor.u32 %v1784_v51, %v1598_v52  ;;  %v1662_v56 = vld [vmem:[#allocation2 + $0xd8] sm:$0xf0]  ;;  %v1588_v63 = vld [vmem:[#allocation2 + $0x40] sm:$0xf]  ;;  %v1783_v0 = vld [vmem:[#allocation2 + $0x44] sm:$0xf0] }
  0x25   : > { %v1665_v60 = vor.u32 %v1800_v55, %v1662_v56  ;;  %v1652_v1 = vld [vmem:[#allocation2 + $0xc0] sm:$0xf]  ;;  %v1589_v2 = vor.u32 %v1783_v0, %v1588_v63  ;;  %v1799_v3 = vld [vmem:[#allocation2 + $0xc4] sm:$0xf0]  ;;  %v1782_v4 = vld [vmem:[#allocation2 + $0x44] sm:$0xf] }
  0x26   : > { %851 = vmatpush.bf16.msrb.mxu1 %v1673_v41  ;;  %810 = vmatpush.bf16.msra.mxu2 %v1597_v45  ;;  %v1590_v5 = vld [vmem:[#allocation2 + $0x48] sm:$0xf0]  ;;  %v1653_v8 = vor.u32 %v1799_v3, %v1652_v1  ;;  %v1781_v16 = vld [vmem:[#allocation2 + $0x34] sm:$0xf0]  ;;  %v1644_v18 = vld [vmem:[#allocation2 + $0xb0] sm:$0xf] }
  0x27   : > { %824 = vmatpush.bf16.msra.mxu3 %v1661_v50  ;;  %v1593_v9 = vor.u32 %v1782_v4, %v1590_v5  ;;  %v1654_v13 = vld [vmem:[#allocation2 + $0xc8] sm:$0xf0]  ;;  %v1797_v19 = vld [vmem:[#allocation2 + $0xb4] sm:$0xf0]  ;;  %v1780_v24 = vld [vmem:[#allocation2 + $0x34] sm:$0xf] }
  0x28   : > { %838 = vmatpush.bf16.msrb.mxu0 %v1601_v54  ;;  %v1645_v23 = vor.u32 %v1797_v19, %v1644_v18  ;;  %v1582_v28 = vld [vmem:[#allocation2 + $0x38] sm:$0xf0]  ;;  %v1796_v31 = vld [vmem:[#allocation2 + $0xb4] sm:$0xf]  ;;  %v1572_v33 = vld [vmem:[#allocation2 + $0x20] sm:$0xf] }
  0x29   : > { %v1585_v30 = vor.u32 %v1780_v24, %v1582_v28  ;;  %v1646_v32 = vld [vmem:[#allocation2 + $0xb8] sm:$0xf0]  ;;  %v1779_v35 = vld [vmem:[#allocation2 + $0x24] sm:$0xf0]  ;;  %v1636_v36 = vld [vmem:[#allocation2 + $0xa0] sm:$0xf] }
  0x2a   : > { %852 = vmatpush.bf16.msrb.mxu1 %v1665_v60  ;;  %811 = vmatpush.bf16.msra.mxu2 %v1589_v2  ;;  %v1649_v34 = vor.u32 %v1796_v31, %v1646_v32  ;;  %v1795_v37 = vld [vmem:[#allocation2 + $0xa4] sm:$0xf0]  ;;  %v1573_v41 = vor.u32 %v1779_v35, %v1572_v33  ;;  %v1778_v43 = vld [vmem:[#allocation2 + $0x24] sm:$0xf]  ;;  %v1574_v46 = vld [vmem:[#allocation2 + $0x28] sm:$0xf0] }
  0x2b   : > { %825 = vmatpush.bf16.msra.mxu3 %v1653_v8  ;;  %v1637_v42 = vor.u32 %v1795_v37, %v1636_v36  ;;  %v1577_v47 = vor.u32 %v1778_v43, %v1574_v46  ;;  %v1638_v50 = vld [vmem:[#allocation2 + $0xa8] sm:$0xf0]  ;;  %v1564_v51 = vld [vmem:[#allocation2 + $0x10] sm:$0xf]  ;;  %v1777_v54 = vld [vmem:[#allocation2 + $0x14] sm:$0xf0] }
  0x2c   : > { %839 = vmatpush.bf16.msrb.mxu0 %v1593_v9  ;;  %v1628_v55 = vld [vmem:[#allocation2 + $0x90] sm:$0xf]  ;;  %v1793_v56 = vld [vmem:[#allocation2 + $0x94] sm:$0xf0]  ;;  %v1566_v1 = vld [vmem:[#allocation2 + $0x18] sm:$0xf0] }
  0x2d   : > { %v1629_v60 = vor.u32 %v1793_v56, %v1628_v55  ;;  %v1792_v4 = vld [vmem:[#allocation2 + $0x94] sm:$0xf]  ;;  %v1630_v5 = vld [vmem:[#allocation2 + $0x98] sm:$0xf0]  ;;  %v1556_v8 = vld [vmem:[#allocation2] sm:$0xf] }
  0x2e   : > { %v1633_v9 = vor.u32 %v1792_v4, %v1630_v5  ;;  %v1558_v18 = vld [vmem:[#allocation2 + $0x8] sm:$0xf0]  ;;  %s1454_s17 = sshll.u32 %s370_s21, 4  ;;  %s1442_s29 = scalar_lea.sflag [#allocation4], %s368_s3  ;;  %s1455_s17 = int_to_ptr.vmem [resolvable:$true] %s1454_s17 }
  0x2f   : > { %826 = vmatpush.bf16.msra.mxu3 %v1645_v23  ;;  %v1790_v23 = vld [vmem:[#allocation2 + $0x84] sm:$0xf]  ;;  %v1622_v24 = vld [vmem:[#allocation2 + $0x88] sm:$0xf0]  ;;  %s1976_s30 = sshra.s32 %s1457_s27, 4  ;;  %s1982_s22 = scalar_lea.hbm %s2532_s10, 32  ;;  %s1977_s30 = int_to_ptr.hbm [resolvable:$true] %s1976_s30 }
  0x30   : > { %840 = vmatpush.bf16.msrb.mxu0 %v1585_v30  ;;  %v1625_v28 = vor.u32 %v1790_v23, %v1622_v24  ;;  %s1978_s11 = scalar_lea.hbm %s1977_s30, 16  ;;  %p1983_p3 = scmp.lt.s32.totalorder %s1977_s30, %s2532_s10 }
  0x31   : > { %p1979_p0 = scmp.ne.s32.totalorder %s1977_s30, %s1978_s11  ;;  %p1984_p4 = scmp.lt.s32.totalorder %s1982_s22, %s1978_s11 }
  0x33   : > { %827 = vmatpush.bf16.msra.mxu3 %v1637_v42  ;;  %p1980_p1 = pnand %p1979_p0, %p2128_p5  ;;  %p1985_p7 = por %p1984_p4, %p1983_p3 }
  0x34   : > { %841 = vmatpush.bf16.msrb.mxu0 %v1577_v47 }
  0x35   : > { %p1981_p2 = pneg %p1980_p1 }
  0x37   : > { %828 = vmatpush.bf16.msra.mxu3 %v1629_v60  ;;  %p1986_p8 = pnand %p1985_p7, %p1981_p2 }
  0x9e   : > { %v413_v15 = vpop.f32.mrf.mxu0  ;;  %v427_v21 = vpop.f32.mrf.mxu1 }
  0x9f   : > { %v2167_v20 = vadd.f32 %v413_v15, %v386_v10  ;;  %v2169_v27 = vadd.f32 %v427_v21, %v387_v11  ;;  %v1580_v15 = vld [vmem:[#allocation2 + $0x30] sm:$0xf] }
  0xa0   : > { %v1581_v17 = vor.u32 %v1781_v16, %v1580_v15 }
  0xa1   : > { %v2172_v29 = vmul.f32 0.70710677, %v2167_v20  ;;  %v2175_v39 = vmul.f32 0.70710677, %v2169_v27 }
  0xa2   : > { %812 = vmatpush.bf16.msra.mxu2 %v1581_v17  ;;  %v1774_v17 = vld [vmem:[#allocation2 + $0x4] sm:$0xf] }
  0xa3   : > { %v440_v57 = vmul.f32 %v2172_v29, %v2172_v29  ;;  %v480_v58 = vmul.f32 %v2175_v39, %v2175_v39 }
  0xa5   : > { %v2193_v6 = vmin.f32 %v440_v57, 16.0  ;;  %v2195_v7 = vmin.f32 %v480_v58, 16.0  ;;  %v1565_v58 = vor.u32 %v1777_v54, %v1564_v51 }
  0xa6   : > { %v415_v44 = vpop.f32.mrf.mxu0  ;;  %v429_v49 = vpop.f32.mrf.mxu1  ;;  %813 = vmatpush.bf16.msra.mxu2 %v1573_v41 }
  0xa7   : > { %v2177_v48 = vadd.f32 %v415_v44, %v386_v10  ;;  %v2179_v53 = vadd.f32 %v429_v49, %v387_v11  ;;  %v1798_v10 = vld [vmem:[#allocation2 + $0xc4] sm:$0xf]  ;;  %v442_v21 = vmul.f32 2.1237322e-06, %v2193_v6  ;;  %v482_v22 = vmul.f32 2.1237322e-06, %v2195_v7 }
  0xa8   : > { %v1657_v14 = vor.u32 %v1798_v10, %v1654_v13  ;;  %v1794_v49 = vld [vmem:[#allocation2 + $0xa4] sm:$0xf]  ;;  %v1775_v10 = vld [vmem:[#allocation2 + $0x4] sm:$0xf0]  ;;  %v453_v30 = vmul.f32 3.8918573e-05, %v2193_v6 }
  0xa9   : > { %v2186_v59 = vmul.f32 0.70710677, %v2177_v48  ;;  %v2189_v61 = vmul.f32 0.70710677, %v2179_v53  ;;  %v443_v38 = vadd.f32 0.00028619796, %v442_v21  ;;  %v1641_v52 = vor.u32 %v1794_v49, %v1638_v50 }
  0xaa   : > { %853 = vmatpush.bf16.msrb.mxu1 %v1657_v14  ;;  %v483_v40 = vadd.f32 0.00028619796, %v482_v22  ;;  %814 = vmatpush.bf16.msra.mxu2 %v1565_v58  ;;  %v1791_v13 = vld [vmem:[#allocation2 + $0x84] sm:$0xf0]  ;;  %v1557_v15 = vor.u32 %v1775_v10, %v1556_v8  ;;  %v1561_v22 = vor.u32 %v1774_v17, %v1558_v18  ;;  %v493_v32 = vmul.f32 3.8918573e-05, %v2195_v7 }
  0xab   : > { %v520_v62 = vmul.f32 %v2186_v59, %v2186_v59  ;;  %v560_v12 = vmul.f32 %v2189_v61, %v2189_v61  ;;  %v444_v57 = vmul.f32 %v443_v38, %v2193_v6  ;;  %v454_v35 = vadd.f32 0.001143296, %v453_v30 }
  0xac   : > { %v484_v63 = vmul.f32 %v483_v40, %v2195_v7  ;;  %v494_v40 = vadd.f32 0.001143296, %v493_v32 }
  0xad   : > { %v2197_v11 = vmin.f32 %v520_v62, 16.0  ;;  %v2204_v26 = vmin.f32 %v560_v12, 16.0  ;;  %v1776_v62 = vld [vmem:[#allocation2 + $0x14] sm:$0xf]  ;;  %v1620_v12 = vld [vmem:[#allocation2 + $0x80] sm:$0xf]  ;;  %v455_v43 = vmul.f32 %v454_v35, %v2193_v6 }
  0xae   : > { %854 = vmatpush.bf16.msrb.mxu1 %v1649_v34  ;;  %v1569_v3 = vor.u32 %v1776_v62, %v1566_v1  ;;  %v445_v14 = vadd.f32 0.0036580483, %v444_v57  ;;  %v1621_v16 = vor.u32 %v1791_v13, %v1620_v12  ;;  %v485_v19 = vadd.f32 0.0036580483, %v484_v63  ;;  %815 = vmatpush.bf16.msra.mxu2 %v1557_v15 }
  0xaf   : > { %v522_v25 = vmul.f32 2.1237322e-06, %v2197_v11  ;;  %v562_v45 = vmul.f32 2.1237322e-06, %v2204_v26  ;;  %v533_v31 = vmul.f32 3.8918573e-05, %v2197_v11 }
  0xb0   : > { %842 = vmatpush.bf16.msrb.mxu0 %v1569_v3  ;;  %829 = vmatpush.bf16.msra.mxu3 %v1621_v16  ;;  %v573_v33 = vmul.f32 3.8918573e-05, %v2204_v26  ;;  %v446_v34 = vmul.f32 %v445_v14, %v2193_v6  ;;  %v486_v37 = vmul.f32 %v485_v19, %v2195_v7  ;;  %v456_v49 = vadd.f32 0.014752088, %v455_v43 }
  0xb1   : > { %v523_v44 = vadd.f32 0.00028619796, %v522_v25  ;;  %v563_v0 = vadd.f32 0.00028619796, %v562_v45  ;;  %v534_v36 = vadd.f32 0.001143296, %v533_v31  ;;  %v495_v45 = vmul.f32 %v494_v40, %v2195_v7 }
  0xb2   : > { %855 = vmatpush.bf16.msrb.mxu1 %v1641_v52  ;;  %v574_v41 = vadd.f32 0.001143296, %v573_v33  ;;  %v447_v47 = vadd.f32 0.05243302, %v446_v34  ;;  %v487_v51 = vadd.f32 0.05243302, %v486_v37  ;;  %v457_v57 = vmul.f32 %v456_v49, %v2193_v6 }
  0xb3   : > { %v524_v2 = vmul.f32 %v523_v44, %v2197_v11  ;;  %v564_v21 = vmul.f32 %v563_v0, %v2204_v26  ;;  %v535_v44 = vmul.f32 %v534_v36, %v2197_v11  ;;  %v496_v54 = vadd.f32 0.014752088, %v495_v45 }
  0xb4   : > { %843 = vmatpush.bf16.msrb.mxu0 %v1561_v22  ;;  %v575_v46 = vmul.f32 %v574_v41, %v2204_v26  ;;  %v448_v63 = vmul.f32 %v447_v47, %v2193_v6  ;;  %v458_v0 = vadd.f32 0.112945676, %v457_v57 }
  0xb5   : > { %v525_v25 = vadd.f32 0.0036580483, %v524_v2  ;;  %v565_v38 = vadd.f32 0.0036580483, %v564_v21  ;;  %v536_v50 = vadd.f32 0.014752088, %v535_v44  ;;  %v497_v60 = vmul.f32 %v496_v54, %v2195_v7 }
  0xb6   : > { %856 = vmatpush.bf16.msrb.mxu1 %v1633_v9  ;;  %v576_v55 = vadd.f32 0.014752088, %v575_v46  ;;  %v488_v2 = vmul.f32 %v487_v51, %v2195_v7  ;;  %v459_v9 = vmul.f32 %v458_v0, %v2193_v6  ;;  %v449_v14 = vadd.f32 0.18741608, %v448_v63 }
  0xb7   : > { %v526_v42 = vmul.f32 %v525_v25, %v2197_v11  ;;  %v566_v52 = vmul.f32 %v565_v38, %v2204_v26  ;;  %v537_v58 = vmul.f32 %v536_v50, %v2197_v11  ;;  %v498_v4 = vadd.f32 0.112945676, %v497_v60 }
  0xb8   : > { %v577_v62 = vmul.f32 %v576_v55, %v2204_v26  ;;  %v460_v15 = vadd.f32 0.4994258, %v459_v9  ;;  %v489_v17 = vadd.f32 0.18741608, %v488_v2  ;;  %v450_v32 = vmul.f32 %v449_v14, %v2193_v6 }
  0xb9   : > { %v527_v56 = vadd.f32 0.05243302, %v526_v42  ;;  %v538_v1 = vadd.f32 0.112945676, %v537_v58  ;;  %v567_v3 = vadd.f32 0.05243302, %v566_v52  ;;  %v499_v12 = vmul.f32 %v498_v4, %v2195_v7 }
  0xba   : > { %857 = vmatpush.bf16.msrb.mxu1 %v1625_v28  ;;  %v578_v5 = vadd.f32 0.112945676, %v577_v62  ;;  %v461_v23 = vmul.f32 %v460_v15, %v2193_v6  ;;  %v490_v33 = vmul.f32 %v489_v17, %v2195_v7  ;;  %v451_v38 = vadd.f32 1.1283791, %v450_v32 }
  0xbb   : > { %v528_v8 = vmul.f32 %v527_v56, %v2197_v11  ;;  %v539_v10 = vmul.f32 %v538_v1, %v2197_v11  ;;  %v568_v18 = vmul.f32 %v567_v3, %v2204_v26  ;;  %v500_v19 = vadd.f32 0.4994258, %v499_v12 }
  0xbc   : > { %v579_v13 = vmul.f32 %v578_v5, %v2204_v26  ;;  %v462_v30 = vadd.f32 1.0, %v461_v23  ;;  %v491_v40 = vadd.f32 1.1283791, %v490_v33 }
  0xbd   : > { %v540_v16 = vadd.f32 0.4994258, %v539_v10  ;;  %v529_v22 = vadd.f32 0.18741608, %v528_v8  ;;  %v501_v25 = vmul.f32 %v500_v19, %v2195_v7  ;;  %v569_v34 = vadd.f32 0.18741608, %v568_v18 }
  0xbe   : > { %v580_v21 = vadd.f32 0.4994258, %v579_v13  ;;  %1884 = vrcp.f32 %v462_v30  ;;  %v472_v43 = vand.u32 2147483647, %v462_v30  ;;  %v474_v6 = vand.u32 2147483648, %v462_v30 }
  0xbf   : > { %v541_v24 = vmul.f32 %v540_v16, %v2197_v11  ;;  %v502_v35 = vadd.f32 1.0, %v501_v25  ;;  %v530_v36 = vmul.f32 %v529_v22, %v2197_v11  ;;  %v570_v41 = vmul.f32 %v569_v34, %v2204_v26 }
  0xc0   : > { %v581_v28 = vmul.f32 %v580_v21, %v2204_v26  ;;  %v452_v11 = vmul.f32 %v451_v38, %v2172_v29  ;;  %v492_v47 = vmul.f32 %v491_v40, %v2175_v39  ;;  %vm468_vm1 = vweird.f32 %v462_v30 }
  0xc1   : > { %v542_v31 = vadd.f32 1.0, %v541_v24  ;;  %v531_v42 = vadd.f32 1.1283791, %v530_v36  ;;  %v571_v49 = vadd.f32 1.1283791, %v570_v41  ;;  %vm2249_vm3 = vcmp.eq.f32.partialorder %v472_v43, 8.507059e+37 }
  0xc2   : > { %v2242_v37 = vadd.f32 1.0, %v581_v28  ;;  %v475_v56 = vor.u32 1.1754944e-38, %v474_v6  ;;  %vm508_vm5 = vweird.f32 %v502_v35  ;;  %v512_v1 = vand.u32 2147483647, %v502_v35 }
  0xc3   : > { %1886 = vrcp.f32 %v542_v31  ;;  %v552_v7 = vand.u32 2147483647, %v542_v31  ;;  %v554_v45 = vand.u32 2147483648, %v542_v31  ;;  %v532_v52 = vmul.f32 %v531_v42, %v2186_v59 }
  0xc4   : > { %1888 = vrcp.f32 %v502_v35  ;;  %v1885_v44 = vpop.eup %1884  ;;  %vm548_vm2 = vweird.f32 %v542_v31  ;;  %v514_v2 = vand.u32 2147483648, %v502_v35  ;;  %vm588_vm10 = vweird.f32 %v2242_v37 }
  0xc5   : > { %1890 = vrcp.f32 %v2242_v37  ;;  %v464_v50 = vmul.f32 %v1885_v44, %v462_v30  ;;  %vm2253_vm4 = vcmp.eq.f32.partialorder %v552_v7, 8.507059e+37  ;;  %v555_v39 = vor.u32 1.1754944e-38, %v554_v45 }
  0xc6   : > { %vm469_vm6 = vweird.f32 %v1885_v44  ;;  %v592_v9 = vand.u32 2147483647, %v2242_v37  ;;  %v594_v10 = vand.u32 2147483648, %v2242_v37  ;;  %vm513_vm14 = vcmp.eq.f32.partialorder %v512_v1, 8.507059e+37 }
  0xc7   : > { %v465_v54 = vsub.f32 1.0, %v464_v50  ;;  %vm470_vm9 = vmor %vm468_vm1, %vm469_vm6  ;;  %v515_v17 = vor.u32 1.1754944e-38, %v514_v2  ;;  %v572_v23 = vmul.f32 %v571_v49, %v2189_v61  ;;  %v432_v40 = vmul.f32 0.5, %v2167_v20  ;;  %v642_v20 = vld [vmem:[%s2526_s4] sm:$0x3] }
  0xc8   : > { %v595_v28 = vor.u32 1.1754944e-38, %v594_v10  ;;  %vm593_vm0 = vcmp.eq.f32.partialorder %v592_v9, 8.507059e+37  ;;  %v434_v41 = vmul.f32 0.5, %v2177_v48  ;;  %v435_v7 = vmul.f32 0.5, %v2179_v53 }
  0xc9   : > { %v1887_v46 = vpop.eup %1886  ;;  %v466_v62 = vmul.f32 %v1885_v44, %v465_v54  ;;  %v645_v48 = vperm.slane %v642_v20, 1 }
  0xca   : > { %v1889_v51 = vpop.eup %1888  ;;  %v544_v26 = vmul.f32 %v1887_v46, %v542_v31  ;;  %vm549_vm7 = vweird.f32 %v1887_v46 }
  0xcb   : > { %v504_v57 = vmul.f32 %v1889_v51, %v502_v35  ;;  %v1891_v58 = vpop.eup %1890  ;;  %v467_v3 = vadd.f32 %v1885_v44, %v466_v62  ;;  %vm509_vm8 = vweird.f32 %v1889_v51  ;;  %vm550_vm11 = vmor %vm548_vm2, %vm549_vm7 }
  0xcc   : > { %v545_v60 = vsub.f32 1.0, %v544_v26  ;;  %v584_v63 = vmul.f32 %v1891_v58, %v2242_v37  ;;  %vm589_vm12 = vweird.f32 %v1891_v58  ;;  %vm510_vm13 = vmor %vm508_vm5, %vm509_vm8 }
  0xcd   : > { %v505_v59 = vsub.f32 1.0, %v504_v57  ;;  %v471_v12 = vsel %vm470_vm9, %v1885_v44, %v467_v3  ;;  %vm590_vm15 = vmor %vm588_vm10, %vm589_vm12  ;;  %v433_v44 = vmul.f32 0.5, %v2169_v27  ;;  %v644_v27 = vperm.slane %v642_v20, 0  ;;  %v1817_v20 = vld [vmem:[%s2527_s5 + $0x58] sm:$0xff] }
  0xce   : > { %v546_v0 = vmul.f32 %v1887_v46, %v545_v60  ;;  %v585_v5 = vsub.f32 1.0, %v584_v63  ;;  %v476_v15 = vsel %vm2249_vm3, %v475_v56, %v471_v12  ;;  %v1820_v12 = vld [vmem:[%s2527_s5 + $0x70] sm:$0xff] }
  0xcf   : > { %v506_v4 = vmul.f32 %v1889_v51, %v505_v59  ;;  %v477_v18 = vmul.f32 %v476_v15, %v452_v11  ;;  %v1821_v59 = vld [vmem:[%s2527_s5 + $0x78] sm:$0xff] }
  0xd0   : > { %v547_v8 = vadd.f32 %v1887_v46, %v546_v0  ;;  %v586_v14 = vmul.f32 %v1891_v58, %v585_v5  ;;  %1188 = vmatpush.bf16.msrb.mxu3 %v1821_v59  ;;  %v1816_v59 = vld [vmem:[%s2527_s5 + $0x50] sm:$0xff] }
  0xd1   : > { %v507_v13 = vadd.f32 %v1889_v51, %v506_v4  ;;  %v1550_v30 = vclamps-f32 %v477_v18, 1.0 }
  0xd2   : > { %v551_v16 = vsel %vm550_vm11, %v1887_v46, %v547_v8  ;;  %v587_v22 = vadd.f32 %v1891_v58, %v586_v14 }
  0xd3   : > { %v556_v19 = vsel %vm2253_vm4, %v555_v39, %v551_v16  ;;  %v511_v21 = vsel %vm510_vm13, %v1889_v51, %v507_v13  ;;  %v600_v35 = vadd.f32 1.0, %v1550_v30 }
  0xd4   : > { %v557_v24 = vmul.f32 %v556_v19, %v532_v52  ;;  %v516_v25 = vsel %vm513_vm14, %v515_v17, %v511_v21  ;;  %v591_v32 = vsel %vm590_vm15, %v1891_v58, %v587_v22  ;;  %1189 = vmatpush.bf16.msrb.mxu3 %v1820_v12  ;;  %v1813_v17 = vld [vmem:[%s2527_s5 + $0x38] sm:$0xff] }
  0xd5   : > { %v517_v31 = vmul.f32 %v516_v25, %v492_v47  ;;  %v596_v34 = vsel %vm593_vm0, %v595_v28, %v591_v32  ;;  %v604_v6 = vmul.f32 %v600_v35, %v432_v40  ;;  %1174 = vmatpush.bf16.msrb.mxu2 %v1813_v17  ;;  %v1812_v40 = vld [vmem:[%s2527_s5 + $0x30] sm:$0xff] }
  0xd6   : > { %v1552_v33 = vclamps-f32 %v557_v24, 1.0  ;;  %v597_v38 = vmul.f32 %v596_v34, %v572_v23  ;;  %v1819_v24 = vld [vmem:[%s2527_s5 + $0x68] sm:$0xff] }
  0xd7   : > { %v1551_v36 = vclamps-f32 %v517_v31, 1.0 }
  0xd8   : > { %v602_v61 = vadd.f32 1.0, %v1552_v33  ;;  %v1553_v42 = vclamps-f32 %v597_v38, 1.0  ;;  %1190 = vmatpush.bf16.msrb.mxu3 %v1819_v24 }
  0xd9   : > { %v601_v43 = vadd.f32 1.0, %v1551_v36  ;;  %1175 = vmatpush.bf16.msrb.mxu2 %v1812_v40 }
  0xda   : > { %v606_v37 = vmul.f32 %v602_v61, %v434_v41  ;;  %v603_v45 = vadd.f32 1.0, %v1553_v42  ;;  %v1818_v41 = vld [vmem:[%s2527_s5 + $0x60] sm:$0xff] }
  0xdb   : > { %v605_v11 = vmul.f32 %v601_v43, %v433_v44 }
  0xdc   : > { %v608_v46 = vpack.c.bf16 %v606_v37, %v604_v6  ;;  %v607_v47 = vmul.f32 %v603_v45, %v435_v7  ;;  %1191 = vmatpush.bf16.msrb.mxu3 %v1818_v41  ;;  %v1811_v7 = vld [vmem:[%s2527_s5 + $0x28] sm:$0xff] }
  0xdd   : > { %1176 = vmatpush.bf16.msrb.mxu2 %v1811_v7 }
  0xde   : > { %816 = vmatmul.bf16.vlgmr.msra.gmra.mxu2 %v608_v46  ;;  %844 = vmatmul.bf16.vlgmr.msrb.gmra.mxu0 %v608_v46  ;;  %v609_v49 = vpack.c.bf16 %v607_v47, %v605_v11 }
  0xe0   : > { %830 = vmatmul.bf16.vlgmr.msra.gmra.mxu3 %v609_v49  ;;  %858 = vmatmul.bf16.vlgmr.msrb.gmra.mxu1 %v609_v49 }
  0xe1   : > { %1192 = vmatpush.bf16.msrb.mxu3 %v1817_v20 }
  0xe5   : > { %1193 = vmatpush.bf16.msrb.mxu3 %v1816_v59 }
 0x15b   : > { %v845_v50 = vpop.f32.mrf.mxu0 }
 0x15c   : > { %v846_v51 = vadd.f32 %v845_v50, %v645_v48 }
 0x15d   : > { %v859_v52 = vpop.f32.mrf.mxu1 }
 0x15e   : > { %v2278_v26 = vadd.f32 %v859_v52, %v846_v51 }
 0x160   : > { %v2281_v53 = vmul.f32 0.70710677, %v2278_v26 }
 0x161   : > { %v817_v54 = vpop.f32.mrf.mxu2 }
 0x162   : > { %v818_v55 = vadd.f32 %v817_v54, %v644_v27  ;;  %v912_v56 = vmul.f32 %v2281_v53, %v2281_v53 }
 0x163   : > { %v847_v57 = vpop.f32.mrf.mxu0  ;;  %v831_v58 = vpop.f32.mrf.mxu3 }
 0x164   : > { %v848_v60 = vadd.f32 %v847_v57, %v645_v48  ;;  %v2285_v29 = vmin.f32 %v912_v56, 16.0  ;;  %v2287_v39 = vadd.f32 %v831_v58, %v818_v55  ;;  %v1810_v58 = vld [vmem:[%s2527_s5 + $0x20] sm:$0xff] }
 0x165   : > { %v861_v62 = vpop.f32.mrf.mxu1  ;;  %1177 = vmatpush.bf16.msrb.mxu2 %v1810_v58 }
 0x166   : > { %v914_v63 = vmul.f32 2.1237322e-06, %v2285_v29  ;;  %v925_v0 = vmul.f32 3.8918573e-05, %v2285_v29  ;;  %v2294_v1 = vadd.f32 %v861_v62, %v848_v60  ;;  %v2297_v2 = vmul.f32 0.70710677, %v2287_v39 }
 0x168   : > { %v926_v3 = vadd.f32 0.001143296, %v925_v0  ;;  %v915_v5 = vadd.f32 0.00028619796, %v914_v63  ;;  %v872_v8 = vmul.f32 %v2297_v2, %v2297_v2  ;;  %v2302_v9 = vmul.f32 0.70710677, %v2294_v1 }
 0x169   : > { %v819_v4 = vpop.f32.mrf.mxu2 }
 0x16a   : > { %v820_v10 = vadd.f32 %v819_v4, %v644_v27  ;;  %v927_v13 = vmul.f32 %v926_v3, %v2285_v29  ;;  %v2308_v14 = vmin.f32 %v872_v8, 16.0  ;;  %v992_v15 = vmul.f32 %v2302_v9, %v2302_v9  ;;  %v1809_v8 = vld [vmem:[%s2527_s5 + $0x18] sm:$0xff] }
 0x16b   : > { %v833_v16 = vpop.f32.mrf.mxu3  ;;  %v916_v21 = vmul.f32 %v915_v5, %v2285_v29  ;;  %1178 = vmatpush.bf16.msrb.mxu2 %v1809_v8 }
 0x16c   : > { %v928_v18 = vadd.f32 0.014752088, %v927_v13  ;;  %v2315_v19 = vadd.f32 %v833_v16, %v820_v10  ;;  %v885_v22 = vmul.f32 3.8918573e-05, %v2308_v14  ;;  %v2319_v23 = vmin.f32 %v992_v15, 16.0  ;;  %v1815_v15 = vld [vmem:[%s2527_s5 + $0x48] sm:$0xff] }
 0x16d   : > { %v874_v30 = vmul.f32 2.1237322e-06, %v2308_v14  ;;  %v917_v36 = vadd.f32 0.0036580483, %v916_v21  ;;  %1194 = vmatpush.bf16.msrb.mxu3 %v1815_v15 }
 0x16e   : > { %v929_v25 = vmul.f32 %v928_v18, %v2285_v29  ;;  %v2326_v28 = vmul.f32 0.70710677, %v2315_v19  ;;  %v886_v31 = vadd.f32 0.001143296, %v885_v22  ;;  %v994_v32 = vmul.f32 2.1237322e-06, %v2319_v23 }
 0x16f   : > { %v1005_v34 = vmul.f32 3.8918573e-05, %v2319_v23  ;;  %v875_v37 = vadd.f32 0.00028619796, %v874_v30  ;;  %v918_v48 = vmul.f32 %v917_v36, %v2285_v29 }
 0x170   : > { %v930_v33 = vadd.f32 0.112945676, %v929_v25  ;;  %v952_v35 = vmul.f32 %v2326_v28, %v2326_v28  ;;  %v887_v38 = vmul.f32 %v886_v31, %v2308_v14  ;;  %v995_v42 = vadd.f32 0.00028619796, %v994_v32  ;;  %v1808_v25 = vld [vmem:[%s2527_s5 + $0x10] sm:$0xff] }
 0x171   : > { %v1006_v43 = vadd.f32 0.001143296, %v1005_v34  ;;  %v876_v27 = vmul.f32 %v875_v37, %v2308_v14  ;;  %v919_v63 = vadd.f32 0.05243302, %v918_v48  ;;  %1179 = vmatpush.bf16.msrb.mxu2 %v1808_v25  ;;  %v1806_v48 = vld [vmem:[%s2527_s5] sm:$0xff] }
 0x172   : > { %v931_v61 = vmul.f32 %v930_v33, %v2285_v29  ;;  %v2341_v6 = vmin.f32 %v952_v35, 16.0  ;;  %v888_v44 = vadd.f32 0.014752088, %v887_v38  ;;  %v996_v51 = vmul.f32 %v995_v42, %v2319_v23  ;;  %v1814_v35 = vld [vmem:[%s2527_s5 + $0x40] sm:$0xff] }
 0x173   : > { %v1007_v46 = vmul.f32 %v1006_v43, %v2319_v23  ;;  %v877_v4 = vadd.f32 0.0036580483, %v876_v27  ;;  %v920_v16 = vmul.f32 %v919_v63, %v2285_v29  ;;  %1195 = vmatpush.bf16.msrb.mxu3 %v1814_v35  ;;  %v1807_v43 = vld [vmem:[%s2527_s5 + $0x8] sm:$0xff] }
 0x174   : > { %v932_v45 = vadd.f32 0.4994258, %v931_v61  ;;  %v889_v11 = vmul.f32 %v888_v44, %v2308_v14  ;;  %v954_v47 = vmul.f32 2.1237322e-06, %v2341_v6  ;;  %v965_v49 = vmul.f32 3.8918573e-05, %v2341_v6 }
 0x175   : > { %v1008_v52 = vadd.f32 0.014752088, %v1007_v46  ;;  %v997_v0 = vadd.f32 0.0036580483, %v996_v51  ;;  %v878_v22 = vmul.f32 %v877_v4, %v2308_v14  ;;  %v921_v36 = vadd.f32 0.18741608, %v920_v16  ;;  %1180 = vmatpush.bf16.msrb.mxu2 %v1807_v43 }
 0x176   : > { %v933_v50 = vmul.f32 %v932_v45, %v2285_v29  ;;  %v890_v54 = vadd.f32 0.112945676, %v889_v11  ;;  %v966_v55 = vadd.f32 0.001143296, %v965_v49  ;;  %v955_v62 = vadd.f32 0.00028619796, %v954_v47 }
 0x177   : > { %v1009_v57 = vmul.f32 %v1008_v52, %v2319_v23  ;;  %v998_v17 = vmul.f32 %v997_v0, %v2319_v23  ;;  %v879_v41 = vadd.f32 0.05243302, %v878_v22  ;;  %v922_v46 = vmul.f32 %v921_v36, %v2285_v29 }
 0x178   : > { %v2357_v56 = vadd.f32 1.0, %v933_v50  ;;  %v891_v60 = vmul.f32 %v890_v54, %v2308_v14  ;;  %v967_v3 = vmul.f32 %v966_v55, %v2341_v6  ;;  %v956_v13 = vmul.f32 %v955_v62, %v2341_v6 }
 0x179   : > { %v1010_v10 = vadd.f32 0.112945676, %v1009_v57  ;;  %v999_v38 = vadd.f32 0.05243302, %v998_v17  ;;  %v880_v20 = vmul.f32 %v879_v41, %v2308_v14  ;;  %v923_v57 = vadd.f32 1.1283791, %v922_v46  ;;  %1181 = vmatpush.bf16.msrb.mxu2 %v1806_v48 }
 0x17a   : > { %1892 = vrcp.f32 %v2357_v56  ;;  %v892_v5 = vadd.f32 0.4994258, %v891_v60  ;;  %v968_v21 = vadd.f32 0.014752088, %v967_v3  ;;  %v957_v34 = vadd.f32 0.0036580483, %v956_v13 }
 0x17b   : > { %v1011_v18 = vmul.f32 %v1010_v10, %v2319_v23  ;;  %v1000_v11 = vmul.f32 %v999_v38, %v2319_v23  ;;  %v946_v50 = vand.u32 2147483648, %v2357_v56  ;;  %vm940_vm2 = vweird.f32 %v2357_v56 }
 0x17c   : > { %v893_v12 = vmul.f32 %v892_v5, %v2308_v14  ;;  %v969_v32 = vmul.f32 %v968_v21, %v2341_v6  ;;  %v958_v7 = vmul.f32 %v957_v34, %v2341_v6  ;;  %v944_v51 = vand.u32 2147483647, %v2357_v56 }
 0x17d   : > { %v1012_v31 = vadd.f32 0.4994258, %v1011_v18  ;;  %v1001_v55 = vadd.f32 0.18741608, %v1000_v11  ;;  %v881_v60 = vadd.f32 0.18741608, %v880_v20  ;;  %v924_v10 = vmul.f32 %v923_v57, %v2281_v53 }
 0x17e   : > { %v2381_v24 = vadd.f32 1.0, %v893_v12  ;;  %v970_v42 = vadd.f32 0.112945676, %v969_v32  ;;  %v959_v52 = vadd.f32 0.05243302, %v958_v7  ;;  %v947_v59 = vor.u32 1.1754944e-38, %v946_v50 }
 0x17f   : > { %v1013_v61 = vmul.f32 %v1012_v31, %v2319_v23  ;;  %vm945_vm4 = vcmp.eq.f32.partialorder %v944_v51, 8.507059e+37  ;;  %v1002_v5 = vmul.f32 %v1001_v55, %v2319_v23  ;;  %v882_v12 = vmul.f32 %v881_v60, %v2308_v14 }
 0x180   : > { %v1893_v30 = vpop.eup %1892  ;;  %1894 = vrcp.f32 %v2381_v24  ;;  %v971_v45 = vmul.f32 %v970_v42, %v2341_v6  ;;  %v960_v3 = vmul.f32 %v959_v52, %v2341_v6  ;;  %vm900_vm5 = vweird.f32 %v2381_v24 }
 0x181   : > { %v936_v33 = vmul.f32 %v1893_v30, %v2357_v56  ;;  %v2396_v44 = vadd.f32 1.0, %v1013_v61  ;;  %vm941_vm1 = vweird.f32 %v1893_v30  ;;  %v904_v15 = vand.u32 2147483647, %v2381_v24 }
 0x182   : > { %v972_v27 = vadd.f32 0.4994258, %v971_v45  ;;  %vm942_vm3 = vmor %vm940_vm2, %vm941_vm1  ;;  %v906_v18 = vand.u32 2147483648, %v2381_v24  ;;  %v961_v21 = vadd.f32 0.18741608, %v960_v3  ;;  %vm1204_vm1 = vcmask 523264  }
 0x183   : > { %v937_v40 = vsub.f32 1.0, %v936_v33  ;;  %1896 = vrcp.f32 %v2396_v44  ;;  %v1026_v23 = vand.u32 2147483648, %v2396_v44  ;;  %v1003_v22 = vadd.f32 1.1283791, %v1002_v5  ;;  %v1881_v3 = vld [vmem:[%s2528_s6] ss:$0 sm:$0xff] }
 0x184   : > { %v973_v62 = vmul.f32 %v972_v27, %v2341_v6  ;;  %v1024_v14 = vand.u32 2147483647, %v2396_v44  ;;  %v883_v25 = vadd.f32 1.1283791, %v882_v12  ;;  %vm905_vm9 = vcmp.eq.f32.partialorder %v904_v15, 8.507059e+37 }
 0x185   : > { %v938_v37 = vmul.f32 %v1893_v30, %v937_v40  ;;  %vm1020_vm10 = vweird.f32 %v2396_v44  ;;  %v907_v35 = vor.u32 1.1754944e-38, %v906_v18  ;;  %v1027_v36 = vor.u32 1.1754944e-38, %v1026_v23  ;;  %v1825_v23 = vld [vmem:[%s2529_s7 + $0x18] sm:$0xff] }
 0x186   : > { %v2402_v47 = vpop.eup %1894  ;;  %v974_v4 = vadd.f32 1.0, %v973_v62  ;;  %v962_v38 = vmul.f32 %v961_v21, %v2341_v6  ;;  %vm1025_vm12 = vcmp.eq.f32.partialorder %v1024_v14, 8.507059e+37  ;;  %v884_v43 = vmul.f32 %v883_v25, %v2297_v2  ;;  %1305 = vmatpush.bf16.msra.mxu0 %v1825_v23  ;;  %v1824_v21 = vld [vmem:[%s2529_s7 + $0x10] sm:$0xff]  ;;  %v1823_v25 = vld [vmem:[%s2529_s7 + $0x8] sm:$0xff] }
 0x187   : > { %v939_v49 = vadd.f32 %v1893_v30, %v938_v37  ;;  %v896_v29 = vmul.f32 %v2402_v47, %v2381_v24  ;;  %vm901_vm6 = vweird.f32 %v2402_v47  ;;  %v1004_v24 = vmul.f32 %v1003_v22, %v2302_v9 }
 0x188   : > { %1898 = vrcp.f32 %v974_v4  ;;  %vm2430_vm8 = vmor %vm900_vm5, %vm901_vm6  ;;  %v984_v46 = vand.u32 2147483647, %v974_v4  ;;  %v986_v11 = vand.u32 2147483648, %v974_v4  ;;  %v865_v6 = vmul.f32 0.5, %v2278_v26 }
 0x189   : > { %v897_v54 = vsub.f32 1.0, %v896_v29  ;;  %v943_v58 = vsel %vm942_vm3, %v1893_v30, %v939_v49  ;;  %v1897_v0 = vpop.eup %1896  ;;  %v867_v9 = vmul.f32 0.5, %v2294_v1  ;;  %vm980_vm14 = vweird.f32 %v974_v4 }
 0x18a   : > { %v948_v56 = vsel %vm945_vm4, %v947_v59, %v943_v58  ;;  %v1016_v8 = vmul.f32 %v1897_v0, %v2396_v44  ;;  %vm1021_vm7 = vweird.f32 %v1897_v0  ;;  %v963_v44 = vadd.f32 1.1283791, %v962_v38  ;;  %1306 = vmatpush.bf16.msra.mxu0 %v1824_v21 }
 0x18b   : > { %v898_v63 = vmul.f32 %v2402_v47, %v897_v54  ;;  %v949_v17 = vmul.f32 %v948_v56, %v924_v10  ;;  %vm1022_vm11 = vmor %vm1020_vm10, %vm1021_vm7  ;;  %v987_v51 = vor.u32 1.1754944e-38, %v986_v11  ;;  %vm985_vm0 = vcmp.eq.f32.partialorder %v984_v46, 8.507059e+37 }
 0x18c   : > { %v1017_v16 = vsub.f32 1.0, %v1016_v8  ;;  %v964_v2 = vmul.f32 %v963_v44, %v2326_v28  ;;  %v864_v26 = vmul.f32 0.5, %v2287_v39  ;;  %v866_v1 = vmul.f32 0.5, %v2315_v19 }
 0x18d   : > { %v899_v13 = vadd.f32 %v2402_v47, %v898_v63  ;;  %v1683_v34 = vclamps-f32 %v949_v17, 1.0 }
 0x18e   : > { %v1018_v53 = vmul.f32 %v1897_v0, %v1017_v16  ;;  %v1899_v33 = vpop.eup %1898  ;;  %1307 = vmatpush.bf16.msra.mxu0 %v1823_v25 }
 0x18f   : > { %v903_v31 = vsel %vm2430_vm8, %v2402_v47, %v899_v13  ;;  %v976_v41 = vmul.f32 %v1899_v33, %v974_v4  ;;  %v1033_v45 = vadd.f32 1.0, %v1683_v34  ;;  %vm981_vm13 = vweird.f32 %v1899_v33 }
 0x190   : > { %v1019_v32 = vadd.f32 %v1897_v0, %v1018_v53  ;;  %v908_v61 = vsel %vm905_vm9, %v907_v35, %v903_v31  ;;  %vm982_vm15 = vmor %vm980_vm14, %vm981_vm13 }
 0x191   : > { %v977_v7 = vsub.f32 1.0, %v976_v41  ;;  %v909_v47 = vmul.f32 %v908_v61, %v884_v43  ;;  %v1037_v29 = vmul.f32 %v1033_v45, %v865_v6 }
 0x192   : > { %v1023_v40 = vsel %vm1022_vm11, %v1897_v0, %v1019_v32  ;;  %v1822_v32 = vld [vmem:[%s2529_s7] sm:$0xff] }
 0x193   : > { %v1028_v42 = vsel %vm1025_vm12, %v1027_v36, %v1023_v40  ;;  %v978_v20 = vmul.f32 %v1899_v33, %v977_v7  ;;  %v1682_v52 = vclamps-f32 %v909_v47, 1.0  ;;  %1308 = vmatpush.bf16.msra.mxu0 %v1822_v32 }
 0x194   : > { %v1029_v37 = vmul.f32 %v1028_v42, %v1004_v24 }
 0x195   : > { %v979_v50 = vadd.f32 %v1899_v33, %v978_v20  ;;  %v1032_v60 = vadd.f32 1.0, %v1682_v52 }
 0x196   : > { %v1685_v49 = vclamps-f32 %v1029_v37, 1.0 }
 0x197   : > { %v983_v54 = vsel %vm982_vm15, %v1899_v33, %v979_v50  ;;  %v1036_v63 = vmul.f32 %v1032_v60, %v864_v26 }
 0x198   : > { %v1035_v48 = vadd.f32 1.0, %v1685_v49  ;;  %v988_v55 = vsel %vm985_vm0, %v987_v51, %v983_v54 }
 0x199   : > { %v989_v57 = vmul.f32 %v988_v55, %v964_v2 }
 0x19a   : > { %v1039_v27 = vmul.f32 %v1035_v48, %v867_v9 }
 0x19b   : > { %v1684_v62 = vclamps-f32 %v989_v57, 1.0 }
 0x19c   : > { %v1041_v58 = vpack.c.bf16 %v1039_v27, %v1037_v29 }
 0x19d   : > { %v1034_v59 = vadd.f32 1.0, %v1684_v62 }
 0x19e   : > { %1196 = vmatmul.bf16.vlgmr.msrb.gmra.mxu3 %v1041_v58 }
 0x19f   : > { %v1038_v0 = vmul.f32 %v1034_v59, %v866_v1 }
 0x1a1   : > { %v1040_v28 = vpack.c.bf16 %v1038_v0, %v1036_v63 }
 0x1a3   : > { %1182 = vmatmul.bf16.vlgmr.msrb.gmra.mxu2 %v1040_v28 }
 0x221   : > { %v1197_v4 = vpop.f32.mrf.mxu3 }
 0x226   : > { %v1183_v56 = vpop.f32.mrf.mxu2 }
 0x227   : > { %v1184_v5 = vadd.f32 %v1881_v3, %v1183_v56 }
 0x229   : > { %v2449_v8 = vadd.f32 %v1197_v4, %v1184_v5  ;;  %v1199_v13 = vpop.f32.mrf.mxu3 }
 0x22b   : > { %v1202_v39 = vmul.f32 %v2449_v8, %v2449_v8 }
 0x22d   : > { %v1205_v19 = vsel %vm1204_vm1, %v1202_v39, 0.0  ;;  %v1264_v39 = vld [vmem:[%s2531_s9] sm:$0x1] }
 0x22e   : > { %v1185_v10 = vpop.f32.mrf.mxu2  ;;  %1206 = vadd.xlane.f32.xlu0 %v1205_v19 }
 0x22f   : > { %v1186_v12 = vadd.f32 %v1881_v3, %v1185_v10 }
 0x231   : > { %v2454_v15 = vadd.f32 %v1199_v13, %v1186_v12  ;;  %v1883_v13 = vld [vmem:[%s2531_s9] ss:$0 sm:$0xff] }
 0x233   : > { %v1203_v16 = vmul.f32 %v2454_v15, %v2454_v15 }
 0x235   : > { %v1208_v17 = vsel %vm1204_vm1, %v1203_v16, 0.0 }
 0x236   : > { %1209 = vadd.xlane.f32.xlu0 %v1208_v17  ;;  %v1882_v17 = vld [vmem:[%s2530_s8] ss:$0 sm:$0xff] }
 0x2a1   : > { %v1207_v18 = vpop.xlane.xlu0 %1206 }
 0x2a2   : > { %1900 = vrsqrt.f32 %v1207_v18  ;;  %vm1218_vm2 = vcmp.eq.f32.partialorder %v1207_v18, inf  ;;  %v1221_v40 = vand.u32 2147483648, %v1207_v18  ;;  %vm1220_vm3 = vcmp.eq.f32.partialorder %v1207_v18, 0.0 }
 0x2a8   : > { %v1901_v22 = vpop.eup %1900 }
 0x2a9   : > { %v1212_v53 = vmul.f32 %v1901_v22, %v1207_v18  ;;  %v1210_v14 = vpop.xlane.xlu0 %1209 }
 0x2aa   : > { %1902 = vrsqrt.f32 %v1210_v14  ;;  %vm1230_vm4 = vcmp.eq.f32.partialorder %v1210_v14, inf  ;;  %v1233_v46 = vand.u32 2147483648, %v1210_v14  ;;  %vm1232_vm5 = vcmp.eq.f32.partialorder %v1210_v14, 0.0 }
 0x2ab   : > { %v1213_v30 = vmul.f32 %v1901_v22, %v1212_v53 }
 0x2ad   : > { %v1214_v31 = vmul.f32 0.5, %v1213_v30 }
 0x2af   : > { %v1215_v33 = vsub.f32 1.5, %v1214_v31 }
 0x2b0   : > { %v1903_v34 = vpop.eup %1902 }
 0x2b1   : > { %v1216_v35 = vmul.f32 %v1901_v22, %v1215_v33  ;;  %v1224_v36 = vmul.f32 %v1903_v34, %v1210_v14  ;;  %v1263_v33 = vld [vmem:[%s2530_s8] sm:$0x1] }
 0x2b3   : > { %v1217_v38 = vmul.f32 %v1216_v35, %v1207_v18  ;;  %v1225_v24 = vmul.f32 %v1903_v34, %v1224_v36 }
 0x2b5   : > { %v1219_v41 = vsel %vm1218_vm2, %v1207_v18, %v1217_v38  ;;  %v1226_v61 = vmul.f32 0.5, %v1225_v24  ;;  %v1351_v24 = vmul.f32 9.0, %v1263_v33 }
 0x2b6   : > { %v1222_v42 = vsel %vm1220_vm3, %v1221_v40, %v1219_v41 }
 0x2b7   : > { %v1235_v43 = vmax.f32 %v1222_v42, 1e-15  ;;  %v1227_v37 = vsub.f32 1.5, %v1226_v61 }
 0x2b9   : > { %v1237_v7 = vmul.f32 1.7320508, %v1235_v43  ;;  %v1228_v45 = vmul.f32 %v1903_v34, %v1227_v37  ;;  %v1353_v43 = vperm.slane %v1351_v24, 0 }
 0x2bb   : > { %1904 = vtanh.f32 %v1237_v7  ;;  %v1229_v44 = vmul.f32 %v1228_v45, %v1210_v14 }
 0x2bd   : > { %v1231_v11 = vsel %vm1230_vm4, %v1210_v14, %v1229_v44 }
 0x2be   : > { %v1234_v47 = vsel %vm1232_vm5, %v1233_v46, %v1231_v11 }
 0x2bf   : > { %v1236_v49 = vmax.f32 %v1234_v47, 1e-15 }
 0x2c1   : > { %v1905_v20 = vpop.eup %1904  ;;  %v1238_v6 = vmul.f32 1.7320508, %v1236_v49 }
 0x2c2   : > { %v1247_v9 = vmul.f32 0.57735026, %v1905_v20 }
 0x2c3   : > { %1906 = vtanh.f32 %v1238_v6 }
 0x2c4   : > { %v1249_v48 = vmax.f32 %v1247_v9, 1e-15 }
 0x2c6   : > { %1908 = vrcp.f32 %v1249_v48  ;;  %v1259_v3 = vmin.f32 %v1249_v48, 0.5750409 }
 0x2c7   : > { %1910 = vrcp.f32 %v1237_v7 }
 0x2c8   : > { %1912 = vrcp.f32 %v1238_v6  ;;  %v1261_v4 = vmul.f32 %v1259_v3, %v1259_v3 }
 0x2c9   : > { %v1907_v50 = vpop.eup %1906 }
 0x2ca   : > { %v1248_v29 = vmul.f32 0.57735026, %v1907_v50  ;;  %v1319_v10 = vmul.f32 3.0, %v1261_v4  ;;  %v1355_v46 = vmul.f32 %v1353_v43, %v1261_v4 }
 0x2cc   : > { %v1250_v2 = vmax.f32 %v1248_v29, 1e-15  ;;  %v1909_v51 = vpop.eup %1908 }
 0x2cd   : > { %v1911_v52 = vpop.eup %1910  ;;  %v1253_v54 = vmul.f32 0.5750409, %v1909_v51 }
 0x2ce   : > { %1914 = vrcp.f32 %v1250_v2  ;;  %v1913_v27 = vpop.eup %1912  ;;  %v1243_v55 = vmul.f32 %v1911_v52, %v1905_v20  ;;  %v1260_v12 = vmin.f32 %v1250_v2, 0.5750409 }
 0x2cf   : > { %v1244_v57 = vmul.f32 %v1913_v27, %v1907_v50  ;;  %v1255_v62 = vmin.f32 %v1253_v54, 1.0 }
 0x2d0   : > { %v1245_v26 = vmul.f32 %v1243_v55, %v2449_v8  ;;  %v1262_v23 = vmul.f32 %v1260_v12, %v1260_v12 }
 0x2d1   : > { %v1246_v1 = vmul.f32 %v1244_v57, %v2454_v15  ;;  %v1341_v15 = vmul.f32 %v1264_v39, %v1264_v39 }
 0x2d2   : > { %v1257_v63 = vmul.f32 %v1255_v62, %v1245_v26  ;;  %v1320_v32 = vmul.f32 3.0, %v1262_v23  ;;  %v1356_v2 = vmul.f32 %v1353_v43, %v1262_v23 }
 0x2d3   : > { %v1343_v53 = vperm.slane %v1341_v15, 0 }
 0x2d4   : > { %v1915_v58 = vpop.eup %1914 }
 0x2d5   : > { %v1254_v60 = vmul.f32 0.5750409, %v1915_v58  ;;  %v1345_v35 = vmul.f32 %v1343_v53, %v1261_v4  ;;  %v1346_v44 = vmul.f32 %v1343_v53, %v1262_v23 }
 0x2d7   : > { %v1256_v59 = vmin.f32 %v1254_v60, 1.0 }
 0x2d9   : > { %v1258_v0 = vmul.f32 %v1256_v59, %v1246_v1 }
 0x2db   : > { %v1265_v28 = vpack.c.bf16 %v1258_v0, %v1257_v63 }
 0x2dd   : > { %1766 = vmatmul.msk.bf16.vlgmr.msra.gmra.mxu0 %vm1204_vm1, %v1265_v28 }
 0x35a   : > { %v1310_v56 = vpop.f32.mrf.mxu0 }
 0x35b   : > { %v1315_v5 = vmul.f32 6.0, %v1310_v56 }
 0x35d   : > { %v1317_v19 = vsub.f32 1.0, %v1315_v5 }
 0x35f   : > { %v1321_v8 = vadd.f32 %v1319_v10, %v1317_v19  ;;  %v1357_v49 = vadd.f32 %v1355_v46, %v1317_v19 }
 0x361   : > { %v1323_v16 = vmul.f32 %v1321_v8, %v1321_v8  ;;  %v1330_v18 = vmul.f32 2.0, %v1321_v8  ;;  %v1359_v48 = vmax.f32 %v1357_v49, 1e-15 }
 0x362   : > { %v1312_v21 = vpop.f32.mrf.mxu0 }
 0x363   : > { %v1335_v22 = vmul.f32 %v1883_v13, %v1330_v18  ;;  %v1316_v14 = vmul.f32 6.0, %v1312_v21  ;;  %v1328_v25 = vmul.f32 %v1882_v17, %v1323_v16 }
 0x365   : > { %v1337_v30 = vmul.f32 %v1335_v22, %v1310_v56  ;;  %v1318_v31 = vsub.f32 1.0, %v1316_v14 }
 0x367   : > { %v1339_v34 = vsub.f32 %v1328_v25, %v1337_v30  ;;  %v1322_v36 = vadd.f32 %v1320_v32, %v1318_v31  ;;  %v1358_v27 = vadd.f32 %v1356_v2, %v1318_v31 }
 0x369   : > { %v1347_v38 = vadd.f32 %v1345_v35, %v1339_v34  ;;  %v1331_v40 = vmul.f32 2.0, %v1322_v36  ;;  %v1324_v41 = vmul.f32 %v1322_v36, %v1322_v36  ;;  %v1360_v62 = vmax.f32 %v1358_v27, 1e-15 }
 0x36b   : > { %v1349_v61 = vmax.f32 %v1347_v38, 0.0  ;;  %v1336_v42 = vmul.f32 %v1883_v13, %v1331_v40  ;;  %v1329_v37 = vmul.f32 %v1882_v17, %v1324_v41 }
 0x36d   : > { %1916 = vrsqrt.f32 %v1349_v61  ;;  %v1338_v7 = vmul.f32 %v1336_v42, %v1312_v21  ;;  %vm1368_vm6 = vcmp.eq.f32.partialorder %v1349_v61, inf  ;;  %v1371_v57 = vand.u32 2147483648, %v1349_v61 }
 0x36e   : > { %vm1370_vm7 = vcmp.eq.f32.partialorder %v1349_v61, 0.0 }
 0x36f   : > { %v1340_v45 = vsub.f32 %v1329_v37, %v1338_v7 }
 0x371   : > { %v1348_v11 = vadd.f32 %v1346_v44, %v1340_v45 }
 0x373   : > { %v1917_v47 = vpop.eup %1916  ;;  %v1350_v6 = vmax.f32 %v1348_v11, 0.0 }
 0x374   : > { %v1362_v20 = vmul.f32 %v1917_v47, %v1349_v61 }
 0x375   : > { %1918 = vrsqrt.f32 %v1350_v6  ;;  %vm1380_vm8 = vcmp.eq.f32.partialorder %v1350_v6, inf  ;;  %v1383_v39 = vand.u32 2147483648, %v1350_v6  ;;  %vm1382_vm9 = vcmp.eq.f32.partialorder %v1350_v6, 0.0 }
 0x376   : > { %v1363_v9 = vmul.f32 %v1917_v47, %v1362_v20  ;;  %1920 = vrcp.f32 %v1359_v48 }
 0x377   : > { %1922 = vrcp.f32 %v1360_v62 }
 0x378   : > { %v1364_v50 = vmul.f32 0.5, %v1363_v9 }
 0x37a   : > { %v1365_v29 = vsub.f32 1.5, %v1364_v50 }
 0x37b   : > { %v1919_v51 = vpop.eup %1918 }
 0x37c   : > { %v1366_v52 = vmul.f32 %v1917_v47, %v1365_v29  ;;  %v1374_v54 = vmul.f32 %v1919_v51, %v1350_v6  ;;  %v1921_v26 = vpop.eup %1920 }
 0x37d   : > { %v1923_v10 = vpop.eup %1922 }
 0x37e   : > { %v1367_v55 = vmul.f32 %v1366_v52, %v1349_v61  ;;  %v1375_v58 = vmul.f32 %v1919_v51, %v1374_v54 }
 0x380   : > { %v1369_v60 = vsel %vm1368_vm6, %v1349_v61, %v1367_v55  ;;  %v1376_v59 = vmul.f32 0.5, %v1375_v58 }
 0x381   : > { %v1372_v1 = vsel %vm1370_vm7, %v1371_v57, %v1369_v60 }
 0x382   : > { %v1387_v63 = vmul.f32 %v1921_v26, %v1372_v1  ;;  %v1377_v0 = vsub.f32 1.5, %v1376_v59 }
 0x384   : > { %v1389_v28 = vmul.f32 1.7320508, %v1387_v63  ;;  %v1378_v3 = vmul.f32 %v1919_v51, %v1377_v0 }
 0x386   : > { %v1391_v4 = vmax.f32 %v1389_v28, 0.0  ;;  %v1379_v56 = vmul.f32 %v1378_v3, %v1350_v6 }
 0x388   : > { %v1393_v5 = vmin.f32 %v1391_v4, 0.9999999  ;;  %v1381_v19 = vsel %vm1380_vm8, %v1350_v6, %v1379_v56 }
 0x389   : > { %v1384_v13 = vsel %vm1382_vm9, %v1383_v39, %v1381_v19 }
 0x38a   : > { %v1395_v12 = vadd.f32 1.0, %v1393_v5  ;;  %v1413_v8 = vsub.f32 0.0, %v1393_v5  ;;  %v1388_v15 = vmul.f32 %v1923_v10, %v1384_v13  ;;  %v1398_v17 = vmul.f32 -0.5, %v1393_v5 }
 0x38b   : > { %v1401_v30 = vand.u32 2147483647, %v1393_v5 }
 0x38c   : > { %1924 = vlog2.f32 %v1395_v12  ;;  %v1415_v16 = vadd.f32 1.0, %v1413_v8  ;;  %v1390_v18 = vmul.f32 1.7320508, %v1388_v15  ;;  %v1418_v23 = vmul.f32 -0.5, %v1413_v8 }
 0x38d   : > { %v1399_v22 = vadd.f32 1.0, %v1398_v17  ;;  %v1421_v31 = vand.u32 2147483647, %v1413_v8  ;;  %vm1402_vm10 = vcmp.lt.f32.partialorder %v1401_v30, 0.0004427343 }
 0x38e   : > { %1926 = vlog2.f32 %v1415_v16  ;;  %v1392_v21 = vmax.f32 %v1390_v18, 0.0  ;;  %v1419_v14 = vadd.f32 1.0, %v1418_v23 }
 0x38f   : > { %v1400_v36 = vmul.f32 %v1399_v22, %v1393_v5  ;;  %vm1422_vm11 = vcmp.lt.f32.partialorder %v1421_v31, 0.0004427343 }
 0x390   : > { %v1394_v53 = vmin.f32 %v1392_v21, 0.9999999  ;;  %v1420_v24 = vmul.f32 %v1419_v14, %v1413_v8 }
 0x392   : > { %v1925_v25 = vpop.eup %1924  ;;  %v1404_v32 = vadd.f32 1.0, %v1394_v53  ;;  %v1414_v33 = vsub.f32 0.0, %v1394_v53  ;;  %v1407_v41 = vmul.f32 -0.5, %v1394_v53  ;;  %v1410_v11 = vand.u32 2147483647, %v1394_v53 }
 0x393   : > { %v1397_v34 = vmul.f32 0.6931472, %v1925_v25 }
 0x394   : > { %v1927_v35 = vpop.eup %1926  ;;  %1928 = vlog2.f32 %v1404_v32  ;;  %v1424_v40 = vadd.f32 1.0, %v1414_v33  ;;  %v1427_v43 = vmul.f32 -0.5, %v1414_v33  ;;  %v1408_v44 = vadd.f32 1.0, %v1407_v41 }
 0x395   : > { %v1417_v38 = vmul.f32 0.6931472, %v1927_v35  ;;  %v1403_v61 = vsel %vm1402_vm10, %v1400_v36, %v1397_v34  ;;  %v1430_v47 = vand.u32 2147483647, %v1414_v33  ;;  %vm1411_vm12 = vcmp.lt.f32.partialorder %v1410_v11, 0.0004427343 }
 0x396   : > { %1930 = vlog2.f32 %v1424_v40  ;;  %v1428_v46 = vadd.f32 1.0, %v1427_v43  ;;  %v1409_v9 = vmul.f32 %v1408_v44, %v1394_v53 }
 0x397   : > { %v1423_v42 = vsel %vm1422_vm11, %v1420_v24, %v1417_v38  ;;  %vm1431_vm13 = vcmp.lt.f32.partialorder %v1430_v47, 0.0004427343 }
 0x398   : > { %v1433_v37 = vsub.f32 %v1403_v61, %v1423_v42  ;;  %v1429_v50 = vmul.f32 %v1428_v46, %v1414_v33 }
 0x39a   : > { %v1435_v7 = vmul.f32 0.5, %v1433_v37  ;;  %v1929_v45 = vpop.eup %1928 }
 0x39b   : > { %v1406_v20 = vmul.f32 0.6931472, %v1929_v45 }
 0x39c   : > { %v1437_v49 = vmul.f32 -11.547006, %v1435_v7  ;;  %v1931_v6 = vpop.eup %1930 }
 0x39d   : > { %v1426_v48 = vmul.f32 0.6931472, %v1931_v6  ;;  %v1412_v29 = vsel %vm1411_vm12, %v1409_v9, %v1406_v20 }
 0x39e   : > { %1439 = vst [vmem:[%s370_s21] sm:$0xff] %v1437_v49 }
 0x39f   : > { %v1432_v2 = vsel %vm1431_vm13, %v1429_v50, %v1426_v48 }
 0x3a0   : > { %v1434_v51 = vsub.f32 %v1412_v29, %v1432_v2 }
 0x3a2   : > { %v1436_v52 = vmul.f32 0.5, %v1434_v51 }
 0x3a4   : > { %v1438_v27 = vmul.f32 -11.547006, %v1436_v52 }
 0x3a6   : > { %1440 = vst [vmem:[%s370_s21 + $0x8] sm:$0xff] %v1438_v27 }
 0x3a7   : > { %1989 = shalt.err (!%p1986_p8)
}
 0x3a8   : > { %s2033_s3 = smov 128   ;;  %s2034_s21 = smov 8  }
 0x3a9   : > { %1831 = dma.vmem_to_hbm [thread:$0]  (%p2128_p5), %s1455_s17, 256, %s1457_s27, %s1442_s29, %s2033_s3, %s2033_s3, %s2034_s21  }
 0x3aa PF: > { %p1843_p9 = scmp.ge.s32.totalorder %s2028_s16, 2  ;;  %s1471_s26 = sand.u32 1, %s2016_s13  }
 0x3ab   : > { %s1472_s28 = scalar_lea.sflag [#allocation4], %s1471_s26 }
 0x3ac   : > { %p1838_p10 = pnand %p1843_p9, %p2132_p6 }
 0x3ae   : > { %p1839_p11 = pneg %p1838_p10 }
 0x3b0   : > { %2011 = dma.done.wait (%p1839_p11), %s1472_s28, 256  }
 0x3b1   : > { %2013 = vsyncadd (%p1839_p11), %s1472_s28, 4294967040  ;;  %s2544_s30 = sld [smem:[#allocation8_spill]]  ;;  %p21_p12 = scmp.ge.s32.totalorder %s2115_s19, 4  }
 0x3b2   : > { %s2545_s13 = smov %s2020_s14  ;;  %s2546_s14 = smov %s2024_s15 }
 0x3b3   : > { %s2548_s16 = smov %s2115_s19  ;;  %23 = sbr.rel (!%p21_p12) target bundleno = 6 (0x6), region = 100 }
 0x3b7   : > { %s2547_s15 = smov %s2544_s30 }
 0x3b8   :  { %1478 = vsyncpa [#allocation3], 1 }
 0x3b9   :  { %1480 = vsyncpa [#allocation3 + $0x1], 1 }
 0x3ba   :  { %1481 = vsyncpa [#allocation4], 1 }
 0x3bb   :  { %1483 = vsyncpa [#allocation4 + $0x1], 1 }

</bundles_post_ra>
